<compile_context>
chip_gen: v7x
topology: tpu7x:2x2x1
jax: 0.10.0
libtpu: 0.0.40
codegen_flags: <defaults>
</compile_context>

<pallas_src>
import jax
import jax.numpy as jnp
from jax.experimental import pallas as pl
from jax.experimental.pallas import tpu as pltpu

IN_F = 8          # input features of the Critic
HID = 256         # hidden width
MAX_TILE_B = 2048 # amortizes the ~0.35us per-grid-step pipeline overhead
MIN_TILE_B = 256


def critic_kernel(x_ref, w1_ref, b1_ref, w2_ref, b2_ref, w3_ref, b3_ref, o_ref):
    # Layer 1: Linear(8 -> 256). bf16 operands, f32 accumulation on the MXU.
    # The degenerate K=8 contraction is padded to the MXU's native depth by the
    # hardware, so no explicit zero-padding of x is needed.
    h1 = jnp.tanh(
        jnp.dot(x_ref[...], w1_ref[...], preferred_element_type=jnp.float32)
        + b1_ref[...]
    )
    # Layer 2: Linear(256 -> 256) + tanh. Cast activations back to bf16 for the
    # MXU; bias-add / tanh stay f32 (v5e has no bf16 VPU/EUP).
    h2 = jnp.tanh(
        jnp.dot(h1.astype(jnp.bfloat16), w2_ref[...],
                preferred_element_type=jnp.float32)
        + b2_ref[...]
    )
    # Layer 3: Linear(256 -> 1). An N=1 MXU dot wastes 255/256 output columns,
    # so use a VPU multiply + cross-lane reduction (XLU); then transpose the
    # (tile_b, 1) column to a lane-dense (1, tile_b) row so the store is
    # unmasked and the output writeback DMA is contiguous.
    col = (jnp.sum(h2 * w3_ref[...].astype(jnp.float32), axis=-1, keepdims=True)
           + b3_ref[...])
    o_ref[...] = jnp.transpose(col).astype(o_ref.dtype)


def _pick_tile_b(batch):
    tile_b = MAX_TILE_B
    # Keep >= 2 grid steps when possible so v7x megacore can shard the batch
    # axis across both TensorCores (no-op on single-TC v5e/v6e), while still
    # amortizing fixed per-step overhead with the largest tile that allows it.
    while tile_b > MIN_TILE_B and pl.cdiv(batch, tile_b) < 2:
        tile_b //= 2
    return tile_b


def critic_forward(x, params, tile_b=None):
    w1, b1, w2, b2, w3, b3 = params
    B = x.shape[0]
    if tile_b is None:
        tile_b = _pick_tile_b(B)
    nb = pl.cdiv(B, tile_b)
    b_pad = nb * tile_b

    # Wrapper-side layout plumbing (done once, outside the kernel):
    #  - cast matmul operands to bf16 (accumulation stays f32 in-kernel),
    #  - zero-pad the batch only when B is not a multiple of tile_b,
    #  - reshape w3 [256, 1] -> [1, 256] for the VPU lane-reduction form.
    xb = x.astype(jnp.bfloat16)
    if b_pad != B:
        xb = jnp.zeros((b_pad, IN_F), jnp.bfloat16).at[:B].set(xb)
    w1b = w1.astype(jnp.bfloat16)
    w2b = w2.astype(jnp.bfloat16)
    w3r = w3.reshape(1, HID).astype(jnp.bfloat16)   # (256,1) -> (1,256), same order

    resident = lambda shape: pl.BlockSpec(shape, lambda i: (0, 0))

    out = pl.pallas_call(
        critic_kernel,
        out_shape=jax.ShapeDtypeStruct((1, b_pad), jnp.float32),  # lane-dense output
        grid=(nb,),
        in_specs=[
            pl.BlockSpec((tile_b, IN_F), lambda i: (i, 0)),   # pipelined x tile (unpadded K=8)
            resident(w1b.shape), resident(b1.shape),          # VMEM-resident weights/biases
            resident(w2b.shape), resident(b2.shape),
            resident(w3r.shape), resident(b3.shape),
        ],
        out_specs=pl.BlockSpec((1, tile_b), lambda i: (0, i)),
        compiler_params=pltpu.CompilerParams(
            dimension_semantics=("parallel",),      # megacore sharding on v7x
            vmem_limit_bytes=32 * 1024 * 1024,      # explicit headroom (v5e scoped default is 16 MiB)
        ),
    )(xb, w1b, b1, w2b, b2, w3r, b3)

    # (1, b_pad) row-major -> (b_pad, 1); drop padded rows.
    return out.reshape(b_pad, 1)[:B]


def init_params(key):
    """Deterministic init mimicking PyTorch nn.Linear defaults:
    U(-1/sqrt(fan_in), 1/sqrt(fan_in)) for weights and biases.
    Weights stored as [in, out] so the kernel computes x @ W + b."""
    dims = [(IN_F, HID), (HID, HID), (HID, 1)]
    params = []
    for (fan_in, fan_out) in dims:
        key, kw, kb = jax.random.split(key, 3)
        bound = 1.0 / jnp.sqrt(fan_in)
        w = jax.random.uniform(kw, (fan_in, fan_out), jnp.float32, -bound, bound)
        b = jax.random.uniform(kb, (1, fan_out), jnp.float32, -bound, bound)
        params += [w, b]
    return params


def critic_reference(x, params):
    """Pure-JAX f32 reference for correctness checking."""
    w1, b1, w2, b2, w3, b3 = params
    h = jnp.tanh(x @ w1 + b1)
    h = jnp.tanh(h @ w2 + b2)
    return h @ w3 + b3


if __name__ == "__main__":
    key = jax.random.PRNGKey(0)
    key, kx = jax.random.split(key)

    B = 1024  # -> tile_b=512, 2 grid steps: exercises the pipeline + v7x megacore
    x = jax.random.normal(kx, (B, IN_F), dtype=jnp.float32)

    params = init_params(key)

    out = critic_forward(x, params)
    out = jax.block_until_ready(out)

    ref = critic_reference(x, params)
    assert out.shape == (B, 1), out.shape
    # bf16 matmul operands (f32 accumulation) -> expect ~1e-2-level deviation
    # from the pure-f32 reference.
    assert jnp.allclose(out, ref, atol=5e-2, rtol=5e-2), (
        float(jnp.max(jnp.abs(out - ref))))

    print("KERNEL_OK")
</pallas_src>

<mosaic_0001>
module attributes {stable_mosaic.version = 11 : i64} {
  func.func @critic_kernel(%arg0: i32, %arg1: memref<512x8xbf16, #tpu.memory_space<vmem>>, %arg2: memref<8x256xbf16, #tpu.memory_space<vmem>>, %arg3: memref<1x256xf32, #tpu.memory_space<vmem>>, %arg4: memref<256x256xbf16, #tpu.memory_space<vmem>>, %arg5: memref<1x256xf32, #tpu.memory_space<vmem>>, %arg6: memref<1x256xbf16, #tpu.memory_space<vmem>>, %arg7: memref<1x1xf32, #tpu.memory_space<vmem>>, %arg8: memref<1x512xf32, #tpu.memory_space<vmem>>) attributes {dimension_semantics = [#tpu.dimension_semantics<parallel>], iteration_bounds = array<i64: 2>, scalar_prefetch = 0 : i64, scratch_operands = 0 : i64, tpu.core_type = #tpu.core_type<tc>, window_params = [{transform_indices = @transform_0, window_bounds = array<i64: 512, 8>}, {pipeline_mode = #tpu.pipeline_mode<synchronous>, transform_indices = @transform_1, window_bounds = array<i64: 8, 256>}, {pipeline_mode = #tpu.pipeline_mode<synchronous>, transform_indices = @transform_2, window_bounds = array<i64: 1, 256>}, {pipeline_mode = #tpu.pipeline_mode<synchronous>, transform_indices = @transform_3, window_bounds = array<i64: 256, 256>}, {pipeline_mode = #tpu.pipeline_mode<synchronous>, transform_indices = @transform_4, window_bounds = array<i64: 1, 256>}, {pipeline_mode = #tpu.pipeline_mode<synchronous>, transform_indices = @transform_5, window_bounds = array<i64: 1, 256>}, {pipeline_mode = #tpu.pipeline_mode<synchronous>, transform_indices = @transform_6, window_bounds = array<i64: 1, 1>}, {transform_indices = @transform_7, window_bounds = array<i64: 1, 512>}]} {
    %c0 = arith.constant 0 : index
    %c0_0 = arith.constant 0 : index
    %0 = vector.load %arg1[%c0, %c0_0] : memref<512x8xbf16, #tpu.memory_space<vmem>>, vector<512x8xbf16>
    %c0_1 = arith.constant 0 : index
    %c0_2 = arith.constant 0 : index
    %1 = vector.load %arg2[%c0_1, %c0_2] : memref<8x256xbf16, #tpu.memory_space<vmem>>, vector<8x256xbf16>
    %cst = arith.constant dense<0.000000e+00> : vector<512x256xf32>
    %2 = tpu.matmul %0, %1, %cst {dimension_numbers = #tpu.dot_dimension_numbers<[1], [0], [0], [1], [0, 0, 1, 1], [], []>} : vector<512x8xbf16>, vector<8x256xbf16>, vector<512x256xf32> -> vector<512x256xf32>
    %c0_3 = arith.constant 0 : index
    %c0_4 = arith.constant 0 : index
    %3 = vector.load %arg3[%c0_3, %c0_4] : memref<1x256xf32, #tpu.memory_space<vmem>>, vector<1x256xf32>
    %4 = vector.broadcast %3 : vector<1x256xf32> to vector<512x256xf32>
    %5 = arith.addf %2, %4 : vector<512x256xf32>
    %6 = math.tanh %5 : vector<512x256xf32>
    %7 = arith.truncf %6 : vector<512x256xf32> to vector<512x256xbf16>
    %c0_5 = arith.constant 0 : index
    %c0_6 = arith.constant 0 : index
    %8 = vector.load %arg4[%c0_5, %c0_6] : memref<256x256xbf16, #tpu.memory_space<vmem>>, vector<256x256xbf16>
    %cst_7 = arith.constant dense<0.000000e+00> : vector<512x256xf32>
    %9 = tpu.matmul %7, %8, %cst_7 {dimension_numbers = #tpu.dot_dimension_numbers<[1], [0], [0], [1], [0, 0, 1, 1], [], []>} : vector<512x256xbf16>, vector<256x256xbf16>, vector<512x256xf32> -> vector<512x256xf32>
    %c0_8 = arith.constant 0 : index
    %c0_9 = arith.constant 0 : index
    %10 = vector.load %arg5[%c0_8, %c0_9] : memref<1x256xf32, #tpu.memory_space<vmem>>, vector<1x256xf32>
    %11 = vector.broadcast %10 : vector<1x256xf32> to vector<512x256xf32>
    %12 = arith.addf %9, %11 : vector<512x256xf32>
    %13 = math.tanh %12 : vector<512x256xf32>
    %c0_10 = arith.constant 0 : index
    %c0_11 = arith.constant 0 : index
    %14 = vector.load %arg6[%c0_10, %c0_11] : memref<1x256xbf16, #tpu.memory_space<vmem>>, vector<1x256xbf16>
    %15 = arith.extf %14 : vector<1x256xbf16> to vector<1x256xf32>
    %16 = vector.broadcast %15 : vector<1x256xf32> to vector<512x256xf32>
    %17 = arith.mulf %13, %16 : vector<512x256xf32>
    %cst_12 = arith.constant dense<0.000000e+00> : vector<512xf32>
    %18 = vector.multi_reduction <add>, %17, %cst_12 [1] : vector<512x256xf32> to vector<512xf32>
    %19 = vector.shape_cast %18 : vector<512xf32> to vector<512x1xf32>
    %c0_13 = arith.constant 0 : index
    %c0_14 = arith.constant 0 : index
    %20 = vector.load %arg7[%c0_13, %c0_14] : memref<1x1xf32, #tpu.memory_space<vmem>>, vector<1x1xf32>
    %21 = vector.broadcast %20 : vector<1x1xf32> to vector<512x1xf32>
    %22 = arith.addf %19, %21 : vector<512x1xf32>
    %23 = tpu.transpose %22, [1, 0] : vector<512x1xf32> -> vector<1x512xf32>
    %c0_15 = arith.constant 0 : index
    %c0_16 = arith.constant 0 : index
    %24 = vector.load %arg8[%c0_15, %c0_16] : memref<1x512xf32, #tpu.memory_space<vmem>>, vector<1x512xf32>
    tpu.vector_store %arg8[%c0_15, %c0_16], %23 {strides = array<i32>} : memref<1x512xf32, #tpu.memory_space<vmem>>, vector<1x512xf32>,
    return
  }
  func.func @transform_0(%arg0: i32) -> (i32, i32) {
    %c0_i32 = arith.constant 0 : i32
    %c0_i32_0 = arith.constant 0 : i32
    return %arg0, %c0_i32 : i32, i32
  }
  func.func @transform_1(%arg0: i32) -> (i32, i32) {
    %c0_i32 = arith.constant 0 : i32
    %c0_i32_0 = arith.constant 0 : i32
    %c0_i32_1 = arith.constant 0 : i32
    return %c0_i32, %c0_i32_0 : i32, i32
  }
  func.func @transform_2(%arg0: i32) -> (i32, i32) {
    %c0_i32 = arith.constant 0 : i32
    %c0_i32_0 = arith.constant 0 : i32
    %c0_i32_1 = arith.constant 0 : i32
    return %c0_i32, %c0_i32_0 : i32, i32
  }
  func.func @transform_3(%arg0: i32) -> (i32, i32) {
    %c0_i32 = arith.constant 0 : i32
    %c0_i32_0 = arith.constant 0 : i32
    %c0_i32_1 = arith.constant 0 : i32
    return %c0_i32, %c0_i32_0 : i32, i32
  }
  func.func @transform_4(%arg0: i32) -> (i32, i32) {
    %c0_i32 = arith.constant 0 : i32
    %c0_i32_0 = arith.constant 0 : i32
    %c0_i32_1 = arith.constant 0 : i32
    return %c0_i32, %c0_i32_0 : i32, i32
  }
  func.func @transform_5(%arg0: i32) -> (i32, i32) {
    %c0_i32 = arith.constant 0 : i32
    %c0_i32_0 = arith.constant 0 : i32
    %c0_i32_1 = arith.constant 0 : i32
    return %c0_i32, %c0_i32_0 : i32, i32
  }
  func.func @transform_6(%arg0: i32) -> (i32, i32) {
    %c0_i32 = arith.constant 0 : i32
    %c0_i32_0 = arith.constant 0 : i32
    %c0_i32_1 = arith.constant 0 : i32
    return %c0_i32, %c0_i32_0 : i32, i32
  }
  func.func @transform_7(%arg0: i32) -> (i32, i32) {
    %c0_i32 = arith.constant 0 : i32
    %c0_i32_0 = arith.constant 0 : i32
    return %c0_i32, %arg0 : i32, i32
  }
}

</mosaic_0001>

<bundles_post_ra>
// kernel: tpu_custom_call.1
= control target key start
LH: loop header
LB: loop body
LE: loop exit
PB: predicated region body
PF: predicated region fallthrough
CT: control target
= control target key end

     0   :  { %s4279_s0 = inlined_call_operand.vmem [shape: bf16[1024,8], index: 0, kind: input, shape index: {}]   ;;  %s4280_s1 = inlined_call_operand.vmem [shape: bf16[8,256], index: 1, kind: input, shape index: {}]   ;;  %s4281_s2 = inlined_call_operand.vmem [shape: f32[1,256], index: 2, kind: input, shape index: {}]   ;;  %s4282_s3 = inlined_call_operand.vmem [shape: bf16[256,256], index: 3, kind: input, shape index: {}]   ;;  %s4283_s4 = inlined_call_operand.vmem [shape: f32[1,256], index: 4, kind: input, shape index: {}]   ;;  %s4284_s5 = inlined_call_operand.vmem [shape: bf16[1,256], index: 5, kind: input, shape index: {}]   ;;  %s4285_s6 = inlined_call_operand.<no memory space> [shape: f32[1,1], index: 6, kind: input, shape index: {}]   ;;  %s4286_s7 = inlined_call_operand.hbm [shape: f32[1,1024], index: 7, kind: output, shape index: {}]  }
   0x1   :  { %v12_v0 = vstv %s4285_s6 }
   0x2   :  { %13 = vst [vmem:[#allocation2] sm:$0x1] %v12_v0 }
   0x3   :  { %14 = vsyncpa [#allocation4], 0 }
   0x4   :  { %16 = vsyncpa [#allocation4 + $0x1], 0  ;;  %s3397_s26 = smov 0   ;;  %s3399_s27 = smov 0  }
   0x5   :  { %s3401_s28 = smov 0   ;;  %s3403_s29 = smov 0  }
   0x6 LB: > { %s2506_s6 = sadd.s32 4294967295, %s3349_s29   ;;  %s2507_s30 = sadd.s32 4294967294, %s3349_s29   ;;  %s3349_s29 = sphi %s3403_s29, %s4292_s29   ;;  %s3345_s28 = sphi %s3401_s28, %s4291_s28   ;;  %s3341_s27 = sphi %s3399_s27, %s4290_s27   ;;  %s3337_s26 = sphi %s3397_s26, %s4289_s26  }
   0x7   : > { %s3420_s8 = sadd.s32 1, %s3349_s29   ;;  %s181_s9 = sadd.s32 1, %s3345_s28 }
   0x8   : > { %s178_s10 = ssub.s32 %s3349_s29, %s3420_s8  ;;  %p191_p0 = scmp.ne.s32.totalorder %s3345_s28, %s3341_s27 }
   0x9   : > { %p179_p1 = scmp.eq.s32.totalorder %s178_s10, 0  ;;  %p192_p2 = scmp.eq.s32.totalorder %s2506_s6, 1 }
   0xa   : > { %p197_p3 = scmp.ne.s32.totalorder %s3341_s27, %s3337_s26  ;;  %p198_p4 = scmp.eq.s32.totalorder %s2507_s30, 1 }
   0xb   : > { %s3430_s11 = scalar_select %p179_p1, %s3345_s28, %s181_s9  }
   0xc   : > { %p3432_p5 = por %p192_p2, %p191_p0  ;;  %p3436_p6 = por %p198_p4, %p197_p3 }
   0xd   : > { %p2510_p7 = scmp.ge.s32.totalorder %s3349_s29, 1  ;;  %p243_p8 = scmp.lt.s32.totalorder %s3349_s29, 3 }
   0xf   : > { %p244_p9 = pnand %p2510_p7, %p243_p8 }
  0x10   : > { %v347_v1 = vld [vmem:[%s4280_s1] sm:$0xff] (!%p244_p9)  ;;  %vm622_vm0 = vcmask (!%p244_p9), 1043456   ;;  %s3445_s16 = sshll.u32 (!%p244_p9), %s2506_s6, 6  ;;  %v3351_v4 = vmov (!%p244_p9), 0   ;;  %v2714_v8 = vld [vmem:[%s4282_s3 + $0x14] ss:$8 sps:$4 sm:$0xff] (!%p244_p9)   ;;  %v350_v0 = vlaneseq (!%p244_p9) }
  0x11   : > { %247 = sbr.rel (%p244_p9) target bundleno = 1119 (0x45f), region = 48  ;;  %v2547_v2 = vcombine.high (!%p244_p9), %v347_v1, %v347_v1  ;;  %v2546_v3 = vcombine.low (!%p244_p9), %v347_v1, %v347_v1  ;;  %661 = vmatprep.mubr.bf16.mxu0 (!%p244_p9), %v3351_v4  ;;  %p276_p10 = scmp.lt.s32.totalorder (!%p244_p9), %s3445_s16, 127  ;;  %v2707_v5 = vld [vmem:[%s4282_s3] ss:$8 sps:$4 sm:$0xff] (!%p244_p9)   ;;  %v2709_v6 = vld [vmem:[%s4282_s3 + $0x4] ss:$8 sps:$4 sm:$0xff] (!%p244_p9)  }
  0x12   : > { %2620 = vmatprep.subr.bf16.mxu1 (!%p244_p9), %v2709_v6  ;;  %v2712_v9 = vld [vmem:[%s4282_s3 + $0x10] ss:$8 sps:$4 sm:$0xff] (!%p244_p9)   ;;  %v2719_v10 = vld [vmem:[%s4282_s3 + $0x24] ss:$8 sps:$4 sm:$0xff] (!%p244_p9)   ;;  %vm525_vm1 = vcmask (!%p244_p9), 64512   ;;  %v3629_v1 = vshrl.u32 (!%p244_p9), %v350_v0, 7  ;;  %s4237_s6 = scalar_lea.hbm (!%p244_p9), %s4286_s7, %s3445_s16 }
  0x13   : > { %2548 = vmatprep.subr.msk.bf16.mxu0 (!%p244_p9), %vm622_vm0, %v2547_v2  ;;  %v624_v7 = vsel (!%p244_p9), %vm622_vm0, %v2546_v3, 0  ;;  %2636 = vmatpush1.bf16.msra.mxu1 (!%p244_p9), %v2707_v5  ;;  %v2717_v12 = vld [vmem:[%s4282_s3 + $0x20] ss:$8 sps:$4 sm:$0xff] (!%p244_p9)   ;;  %v2722_v15 = vld [vmem:[%s4282_s3 + $0x30] ss:$8 sps:$4 sm:$0xff] (!%p244_p9)   ;;  %s272_s20 = sand.u32 (!%p244_p9), 1, %s3341_s27  }
  0x14   : > { %630 = vmatpush1.bf16.msra.mxu0 (!%p244_p9), %v624_v7  ;;  %2621 = vmatprep.subr.bf16.mxu1 (!%p244_p9), %v2714_v8  ;;  %v2724_v16 = vld [vmem:[%s4282_s3 + $0x34] ss:$8 sps:$4 sm:$0xff] (!%p244_p9)   ;;  %v2727_v18 = vld [vmem:[%s4282_s3 + $0x40] ss:$8 sps:$4 sm:$0xff] (!%p244_p9)   ;;  %v2729_v19 = vld [vmem:[%s4282_s3 + $0x44] ss:$8 sps:$4 sm:$0xff] (!%p244_p9)  }
  0x15   : > { %1378 = vmatprep.subr.bf16.mxu0 (!%p244_p9), %v2709_v6  ;;  %v2732_v22 = vld [vmem:[%s4282_s3 + $0x50] ss:$8 sps:$4 sm:$0xff] (!%p244_p9)   ;;  %v2734_v23 = vld [vmem:[%s4282_s3 + $0x54] ss:$8 sps:$4 sm:$0xff] (!%p244_p9)   ;;  %v2737_v26 = vld [vmem:[%s4282_s3 + $0x60] ss:$8 sps:$4 sm:$0xff] (!%p244_p9)  }
  0x16   : > { %v2739_v27 = vld [vmem:[%s4282_s3 + $0x64] ss:$8 sps:$4 sm:$0xff] (!%p244_p9)   ;;  %v2742_v30 = vld [vmem:[%s4282_s3 + $0x70] ss:$8 sps:$4 sm:$0xff] (!%p244_p9)   ;;  %v2744_v31 = vld [vmem:[%s4282_s3 + $0x74] ss:$8 sps:$4 sm:$0xff] (!%p244_p9)  }
  0x17   : > { %2637 = vmatpush1.bf16.msra.mxu1 (!%p244_p9), %v2712_v9  ;;  %v2747_v34 = vld [vmem:[%s4282_s3 + $0x80] ss:$8 sps:$4 sm:$0xff] (!%p244_p9)   ;;  %v2749_v35 = vld [vmem:[%s4282_s3 + $0x84] ss:$8 sps:$4 sm:$0xff] (!%p244_p9)   ;;  %v2751_v37 = vld [vmem:[%s4282_s3 + $0x94] ss:$8 sps:$4 sm:$0xff] (!%p244_p9)  }
  0x18   : > { %s277_s21 = scalar_select %p276_p10, %s3445_s16, 127  ;;  %2622 = vmatprep.subr.bf16.mxu1 %v2719_v10  ;;  %v2753_v38 = vld [vmem:[%s4282_s3 + $0x90] ss:$8 sps:$4 sm:$0xff]   ;;  %v2754_v40 = vld [vmem:[%s4282_s3 + $0xa4] ss:$8 sps:$4 sm:$0xff]   ;;  %v3634_v3 = vsub.s32 0, %v3629_v1 }
  0x19   : > { %v2757_v41 = vld [vmem:[%s4282_s3 + $0xa0] ss:$8 sps:$4 sm:$0xff]   ;;  %v2758_v42 = vld [vmem:[%s4282_s3 + $0xb4] ss:$8 sps:$4 sm:$0xff]   ;;  %v2760_v43 = vld [vmem:[%s4282_s3 + $0xb0] ss:$8 sps:$4 sm:$0xff]  }
  0x1a   : > { %s2513_s9 = sshll.u32 %s277_s21, 2  ;;  %v2761_v45 = vld [vmem:[%s4282_s3 + $0xc4] ss:$8 sps:$4 sm:$0xff]   ;;  %v2764_v46 = vld [vmem:[%s4282_s3 + $0xc0] ss:$8 sps:$4 sm:$0xff]   ;;  %v356_v6 = vsub.s32 1, %v3629_v1 }
  0x1b   : > { %s3468_s15 = scalar_lea.vmem %s4279_s0, %s2513_s9  ;;  %2638 = vmatpush1.bf16.msra.mxu1 %v2717_v12  ;;  %v2765_v47 = vld [vmem:[%s4282_s3 + $0xd4] ss:$8 sps:$4 sm:$0xff]   ;;  %v2767_v48 = vld [vmem:[%s4282_s3 + $0xd0] ss:$8 sps:$4 sm:$0xff]   ;;  %v2768_v50 = vld [vmem:[%s4282_s3 + $0xe4] ss:$8 sps:$4 sm:$0xff]  }
  0x1c   : > { %v2695_v11 = vld [vmem:[%s3468_s15] sm:$0xff]   ;;  %v2696_v13 = vld [vmem:[%s3468_s15 + $0x8] sm:$0xff]   ;;  %v2697_v14 = vld [vmem:[%s3468_s15 + $0x10] sm:$0xff]   ;;  %2623 = vmatprep.subr.bf16.mxu1 %v2724_v16  ;;  %s2511_s21 = sshll.u32 %s272_s20, 2  ;;  %vm2430_vm2 = vcmp.lt.s32.totalorder %v350_v0, 512  ;;  %s2434_s30 = scalar_lea.sflag [#allocation4], %s272_s20 }
  0x1d   : > { %2549 = vmatmul.mubr.msk.bf16.vlgmr.msra.gmra.mrb[0].mxu0 %vm525_vm1, %v2695_v11  ;;  %v2698_v17 = vld [vmem:[%s3468_s15 + $0x18] sm:$0xff]   ;;  %v2699_v20 = vld [vmem:[%s3468_s15 + $0x20] sm:$0xff]   ;;  %v2700_v21 = vld [vmem:[%s3468_s15 + $0x28] sm:$0xff]   ;;  %s274_s22 = scalar_lea.vmem [#allocation3], %s2511_s21  ;;  %s3353_s10 = smov [#allocation3]  }
  0x1e   : > { %671 = vmatprep.mubr.bf16.mxu0 %v3351_v4  ;;  %1379 = vmatpush1.bf16.msra.mxu0 %v2707_v5  ;;  %v2701_v24 = vld [vmem:[%s3468_s15 + $0x30] sm:$0xff]   ;;  %v2702_v25 = vld [vmem:[%s3468_s15 + $0x38] sm:$0xff]   ;;  %v2703_v28 = vld [vmem:[%s3468_s15 + $0x40] sm:$0xff]   ;;  %s2448_s23 = sshll.u32 %s274_s22, 4  ;;  %s3291_s14 = sshll.u32 %s3353_s10, 4  ;;  %s4239_s23 = int_to_ptr.vmem [resolvable:$true] %s2448_s23  ;;  %s3292_s14 = int_to_ptr.vmem [resolvable:$false] %s3291_s14 }
  0x1f   : > { %1380 = vmatprep.subr.bf16.mxu0 %v2714_v8  ;;  %2639 = vmatpush1.bf16.msra.mxu1 %v2722_v15  ;;  %v2704_v29 = vld [vmem:[%s3468_s15 + $0x48] sm:$0xff]   ;;  %v2705_v32 = vld [vmem:[%s3468_s15 + $0x50] sm:$0xff]   ;;  %v2706_v33 = vld [vmem:[%s3468_s15 + $0x58] sm:$0xff]   ;;  %s3287_s9 = scalar_lea.vmem %s4239_s23, 64  ;;  %p3294_p0 = scmp.lt.s32.totalorder %s4239_s23, %s3292_s14 }
  0x20   : > { %2624 = vmatprep.subr.bf16.mxu1 %v2729_v19  ;;  %v2710_v36 = vld [vmem:[%s3468_s15 + $0x60] sm:$0xff]   ;;  %v2711_v39 = vld [vmem:[%s3468_s15 + $0x68] sm:$0xff]   ;;  %v2715_v44 = vld [vmem:[%s3468_s15 + $0x70] sm:$0xff]   ;;  %p3288_p11 = scmp.ne.s32.totalorder %s4239_s23, %s3287_s9 }
  0x21   : > { %v2716_v49 = vld [vmem:[%s3468_s15 + $0x78] sm:$0xff]   ;;  %v2771_v51 = vld [vmem:[%s4282_s3 + $0xe0] ss:$8 sps:$4 sm:$0xff]   ;;  %v2725_v56 = vld [vmem:[%s3468_s15 + $0x90] sm:$0xff]  }
  0x22   : > { %1381 = vmatpush1.bf16.msra.mxu0 %v2712_v9  ;;  %v2772_v52 = vld [vmem:[%s4282_s3 + $0xf4] ss:$8 sps:$4 sm:$0xff]   ;;  %v2774_v53 = vld [vmem:[%s4282_s3 + $0xf0] ss:$8 sps:$4 sm:$0xff]   ;;  %v2720_v54 = vld [vmem:[%s3468_s15 + $0x80] sm:$0xff]   ;;  %p3289_p12 = pnand %p3288_p11, %p3432_p5 }
  0x23   : > { %1382 = vmatprep.subr.bf16.mxu0 %v2719_v10  ;;  %2640 = vmatpush1.bf16.msra.mxu1 %v2727_v18  ;;  %v2721_v55 = vld [vmem:[%s3468_s15 + $0x88] sm:$0xff]   ;;  %v2726_v57 = vld [vmem:[%s3468_s15 + $0x98] sm:$0xff]   ;;  %v2730_v58 = vld [vmem:[%s3468_s15 + $0xa0] sm:$0xff]  }
  0x24   : > { %2625 = vmatprep.subr.bf16.mxu1 %v2734_v23  ;;  %v2731_v59 = vld [vmem:[%s3468_s15 + $0xa8] sm:$0xff]   ;;  %v2735_v60 = vld [vmem:[%s3468_s15 + $0xb0] sm:$0xff]   ;;  %v2736_v61 = vld [vmem:[%s3468_s15 + $0xb8] sm:$0xff]   ;;  %p3290_p13 = pneg %p3289_p12 }
  0x25   : > { %2550 = vmatmul.mubr.msk.bf16.gmra.mrb[4].mxu0 %vm525_vm1, %v2696_v13  ;;  %v2740_v62 = vld [vmem:[%s3468_s15 + $0xc0] sm:$0xff]   ;;  %v2741_v63 = vld [vmem:[%s3468_s15 + $0xc8] sm:$0xff]   ;;  %v2745_v2 = vld [vmem:[%s3468_s15 + $0xd0] sm:$0xff]  }
  0x26   : > { %681 = vmatprep.mubr.bf16.mxu0 %v3351_v4  ;;  %1383 = vmatpush1.bf16.msra.mxu0 %v2717_v12  ;;  %v348_v5 = vld [vmem:[%s4281_s2] sm:$0x3]  ;;  %v2746_v12 = vld [vmem:[%s3468_s15 + $0xd8] sm:$0xff]  }
  0x27   : > { %1384 = vmatprep.subr.bf16.mxu0 %v2724_v16  ;;  %2641 = vmatpush1.bf16.msra.mxu1 %v2732_v22  ;;  %v3642_v7 = vrot.slane %v348_v5, %v3634_v3  ;;  %v3646_v8 = vrot.slane %v348_v5, %v356_v6  ;;  %v2770_v5 = vld [vmem:[%s3468_s15 + $0xf8] sm:$0xff]  }
  0x28   : > { %2626 = vmatprep.subr.bf16.mxu1 %v2739_v27 }
  0x2a   : > { %1385 = vmatpush1.bf16.msra.mxu0 %v2722_v15 }
  0x2b   : > { %1386 = vmatprep.subr.bf16.mxu0 %v2729_v19  ;;  %2642 = vmatpush1.bf16.msra.mxu1 %v2737_v26 }
  0x2c   : > { %2627 = vmatprep.subr.bf16.mxu1 %v2744_v31 }
  0x2d   : > { %2551 = vmatmul.mubr.msk.bf16.gmra.mrb[8].mxu0 %vm525_vm1, %v2697_v14 }
  0x2e   : > { %691 = vmatprep.mubr.bf16.mxu0 %v3351_v4  ;;  %1387 = vmatpush1.bf16.msra.mxu0 %v2727_v18 }
  0x2f   : > { %1388 = vmatprep.subr.bf16.mxu0 %v2734_v23  ;;  %2643 = vmatpush1.bf16.msra.mxu1 %v2742_v30 }
  0x30   : > { %2628 = vmatprep.subr.bf16.mxu1 %v2749_v35 }
  0x32   : > { %1389 = vmatpush1.bf16.msra.mxu0 %v2732_v22 }
  0x33   : > { %1390 = vmatprep.subr.bf16.mxu0 %v2739_v27  ;;  %2644 = vmatpush1.bf16.msra.mxu1 %v2747_v34 }
  0x34   : > { %2629 = vmatprep.subr.bf16.mxu1 %v2751_v37 }
  0x35   : > { %2552 = vmatmul.mubr.msk.bf16.gmra.mrb[12].mxu0 %vm525_vm1, %v2698_v17 }
  0x36   : > { %701 = vmatprep.mubr.bf16.mxu0 %v3351_v4  ;;  %1391 = vmatpush1.bf16.msra.mxu0 %v2737_v26 }
  0x37   : > { %1392 = vmatprep.subr.bf16.mxu0 %v2744_v31  ;;  %2645 = vmatpush1.bf16.msra.mxu1 %v2753_v38 }
  0x38   : > { %2630 = vmatprep.subr.bf16.mxu1 %v2754_v40 }
  0x3a   : > { %1393 = vmatpush1.bf16.msra.mxu0 %v2742_v30 }
  0x3b   : > { %1394 = vmatprep.subr.bf16.mxu0 %v2749_v35  ;;  %2646 = vmatpush1.bf16.msra.mxu1 %v2757_v41  ;;  %v2756_v35 = vld [vmem:[%s3468_s15 + $0xe8] sm:$0xff]  }
  0x3c   : > { %2631 = vmatprep.subr.bf16.mxu1 %v2758_v42 }
  0x3d   : > { %2553 = vmatmul.mubr.msk.bf16.gmra.mrb[16].mxu0 %vm525_vm1, %v2699_v20 }
  0x3e   : > { %711 = vmatprep.mubr.bf16.mxu0 %v3351_v4  ;;  %1395 = vmatpush1.bf16.msra.mxu0 %v2747_v34 }
  0x3f   : > { %1396 = vmatprep.subr.bf16.mxu0 %v2751_v37  ;;  %2647 = vmatpush1.bf16.msra.mxu1 %v2760_v43 }
  0x40   : > { %2632 = vmatprep.subr.bf16.mxu1 %v2761_v45 }
  0x42   : > { %1397 = vmatpush1.bf16.msra.mxu0 %v2753_v38 }
  0x43   : > { %1398 = vmatprep.subr.bf16.mxu0 %v2754_v40  ;;  %2648 = vmatpush1.bf16.msra.mxu1 %v2764_v46 }
  0x44   : > { %2633 = vmatprep.subr.bf16.mxu1 %v2765_v47 }
  0x45   : > { %2554 = vmatmul.mubr.msk.bf16.gmra.mrb[20].mxu0 %vm525_vm1, %v2700_v21  ;;  %v2750_v21 = vld [vmem:[%s3468_s15 + $0xe0] sm:$0xff]  }
  0x46   : > { %721 = vmatprep.mubr.bf16.mxu0 %v3351_v4  ;;  %1399 = vmatpush1.bf16.msra.mxu0 %v2757_v41 }
  0x47   : > { %1400 = vmatprep.subr.bf16.mxu0 %v2758_v42  ;;  %2649 = vmatpush1.bf16.msra.mxu1 %v2767_v48 }
  0x48   : > { %2634 = vmatprep.subr.bf16.mxu1 %v2768_v50 }
  0x4a   : > { %1401 = vmatpush1.bf16.msra.mxu0 %v2760_v43 }
  0x4b   : > { %1402 = vmatprep.subr.bf16.mxu0 %v2761_v45  ;;  %2650 = vmatpush1.bf16.msra.mxu1 %v2771_v51 }
  0x4c   : > { %2635 = vmatprep.subr.bf16.mxu1 %v2772_v52 }
  0x4d   : > { %2555 = vmatmul.mubr.msk.bf16.gmra.mrb[24].mxu0 %vm525_vm1, %v2701_v24 }
  0x4e   : > { %731 = vmatprep.mubr.bf16.mxu0 %v3351_v4  ;;  %1403 = vmatpush1.bf16.msra.mxu0 %v2764_v46 }
  0x4f   : > { %1404 = vmatprep.subr.bf16.mxu0 %v2765_v47  ;;  %2651 = vmatpush1.bf16.msra.mxu1 %v2774_v53 }
  0x52   : > { %1405 = vmatpush1.bf16.msra.mxu0 %v2767_v48 }
  0x53   : > { %1406 = vmatprep.subr.bf16.mxu0 %v2768_v50  ;;  %v2763_v50 = vld [vmem:[%s3468_s15 + $0xf0] sm:$0xff]   ;;  %s3293_s15 = scalar_lea.vmem %s3292_s14, 128 }
  0x54   : > { %p3295_p1 = scmp.lt.s32.totalorder %s3293_s15, %s3287_s9 }
  0x55   : > { %2556 = vmatmul.mubr.msk.bf16.gmra.mrb[28].mxu0 %vm525_vm1, %v2702_v25 }
  0x56   : > { %741 = vmatprep.mubr.bf16.mxu0 %v3351_v4  ;;  %1407 = vmatpush1.bf16.msra.mxu0 %v2771_v51  ;;  %p3296_p2 = por %p3295_p1, %p3294_p0 }
  0x57   : > { %1408 = vmatprep.subr.bf16.mxu0 %v2772_v52 }
  0x58   : > { %p3297_p3 = pnand %p3296_p2, %p3290_p13 }
  0x5a   : > { %1409 = vmatpush1.bf16.msra.mxu0 %v2774_v53 }
  0x5d   : > { %2557 = vmatmul.mubr.msk.bf16.gmra.mrb[32].mxu0 %vm525_vm1, %v2703_v28 }
  0x5e   : > { %751 = vmatprep.mubr.bf16.mxu0 %v3351_v4 }
  0x65   : > { %2558 = vmatmul.mubr.msk.bf16.gmra.mrb[36].mxu0 %vm525_vm1, %v2704_v29 }
  0x66   : > { %761 = vmatprep.mubr.bf16.mxu0 %v3351_v4 }
  0x6d   : > { %2559 = vmatmul.mubr.msk.bf16.gmra.mrb[40].mxu0 %vm525_vm1, %v2705_v32 }
  0x6e   : > { %771 = vmatprep.mubr.bf16.mxu0 %v3351_v4 }
  0x75   : > { %2560 = vmatmul.mubr.msk.bf16.gmra.mrb[44].mxu0 %vm525_vm1, %v2706_v33 }
  0x76   : > { %781 = vmatprep.mubr.bf16.mxu0 %v3351_v4 }
  0x7d   : > { %2561 = vmatmul.mubr.msk.bf16.gmra.mrb[48].mxu0 %vm525_vm1, %v2710_v36 }
  0x7e   : > { %791 = vmatprep.mubr.bf16.mxu0 %v3351_v4 }
  0x85   : > { %2562 = vmatmul.mubr.msk.bf16.gmra.mrb[52].mxu0 %vm525_vm1, %v2711_v39 }
  0x86   : > { %801 = vmatprep.mubr.bf16.mxu0 %v3351_v4 }
  0x8d   : > { %2563 = vmatmul.mubr.msk.bf16.gmra.mrb[56].mxu0 %vm525_vm1, %v2715_v44 }
  0x8e   : > { %811 = vmatprep.mubr.bf16.mxu0 %v3351_v4 }
  0x95   : > { %2564 = vmatmul.mubr.msk.bf16.gmra.mrb[60].mxu0 %vm525_vm1, %v2716_v49 }
  0x96   : > { %821 = vmatprep.mubr.bf16.mxu0 %v3351_v4 }
  0x9d   : > { %2565 = vmatmul.mubr.msk.bf16.gmra.mrb[64].mxu0 %vm525_vm1, %v2720_v54 }
  0x9e   : > { %831 = vmatprep.mubr.bf16.mxu0 %v3351_v4 }
  0xa5   : > { %2566 = vmatmul.mubr.msk.bf16.gmra.mrb[68].mxu0 %vm525_vm1, %v2721_v55 }
  0xa6   : > { %841 = vmatprep.mubr.bf16.mxu0 %v3351_v4 }
  0xad   : > { %2567 = vmatmul.mubr.msk.bf16.gmra.mrb[72].mxu0 %vm525_vm1, %v2725_v56 }
  0xae   : > { %851 = vmatprep.mubr.bf16.mxu0 %v3351_v4 }
  0xb5   : > { %2568 = vmatmul.mubr.msk.bf16.gmra.mrb[76].mxu0 %vm525_vm1, %v2726_v57 }
  0xb6   : > { %861 = vmatprep.mubr.bf16.mxu0 %v3351_v4 }
  0xbd   : > { %2569 = vmatmul.mubr.msk.bf16.gmra.mrb[80].mxu0 %vm525_vm1, %v2730_v58 }
  0xbe   : > { %871 = vmatprep.mubr.bf16.mxu0 %v3351_v4 }
  0xc5   : > { %2570 = vmatmul.mubr.msk.bf16.gmra.mrb[84].mxu0 %vm525_vm1, %v2731_v59 }
  0xc6   : > { %881 = vmatprep.mubr.bf16.mxu0 %v3351_v4 }
  0xcd   : > { %2571 = vmatmul.mubr.msk.bf16.gmra.mrb[88].mxu0 %vm525_vm1, %v2735_v60 }
  0xce   : > { %891 = vmatprep.mubr.bf16.mxu0 %v3351_v4 }
  0xd5   : > { %2572 = vmatmul.mubr.msk.bf16.gmra.mrb[92].mxu0 %vm525_vm1, %v2736_v61 }
  0xd6   : > { %901 = vmatprep.mubr.bf16.mxu0 %v3351_v4 }
  0xdd   : > { %2573 = vmatmul.mubr.msk.bf16.gmra.mrb[96].mxu0 %vm525_vm1, %v2740_v62 }
  0xde   : > { %911 = vmatprep.mubr.bf16.mxu0 %v3351_v4 }
  0xe5   : > { %2574 = vmatmul.mubr.msk.bf16.gmra.mrb[100].mxu0 %vm525_vm1, %v2741_v63 }
  0xe6   : > { %921 = vmatprep.mubr.bf16.mxu0 %v3351_v4 }
  0xed   : > { %2575 = vmatmul.mubr.msk.bf16.gmra.mrb[104].mxu0 %vm525_vm1, %v2745_v2 }
  0xee   : > { %931 = vmatprep.mubr.bf16.mxu0 %v3351_v4 }
  0xf0   : > { %v663_v9 = vpop.f32.mrb[0].mxu0 }
  0xf1   : > { %v664_v10 = vadd.f32 %v663_v9, %v3642_v7  ;;  %v665_v11 = vpop.f32.mrb[1].mxu0 }
  0xf2   : > { %v666_v13 = vadd.f32 %v665_v11, %v3646_v8  ;;  %v667_v14 = vpop.f32.mrb[2].mxu0 }
  0xf3   : > { %2775 = vtanh.f32 %v664_v10  ;;  %v668_v15 = vadd.f32 %v667_v14, %v3642_v7  ;;  %v669_v16 = vpop.f32.mrb[3].mxu0 }
  0xf4   : > { %2777 = vtanh.f32 %v666_v13  ;;  %v670_v17 = vadd.f32 %v669_v16, %v3646_v8 }
  0xf5   : > { %2779 = vtanh.f32 %v668_v15  ;;  %2576 = vmatmul.mubr.msk.bf16.gmra.mrb[108].mxu0 %vm525_vm1, %v2746_v12 }
  0xf6   : > { %2781 = vtanh.f32 %v670_v17  ;;  %941 = vmatprep.mubr.bf16.mxu0 %v3351_v4 }
  0xf8   : > { %v673_v18 = vpop.f32.mrb[4].mxu0 }
  0xf9   : > { %v674_v19 = vadd.f32 %v673_v18, %v3642_v7  ;;  %v675_v20 = vpop.f32.mrb[5].mxu0 }
  0xfa   : > { %v676_v22 = vadd.f32 %v675_v20, %v3646_v8  ;;  %v677_v23 = vpop.f32.mrb[6].mxu0 }
  0xfb   : > { %2783 = vtanh.f32 %v674_v19  ;;  %v678_v24 = vadd.f32 %v677_v23, %v3642_v7  ;;  %v679_v25 = vpop.f32.mrb[7].mxu0 }
  0xfc   : > { %2785 = vtanh.f32 %v676_v22  ;;  %v680_v26 = vadd.f32 %v679_v25, %v3646_v8 }
  0xfd   : > { %v3661_v27 = vpop.eup %2775  ;;  %2787 = vtanh.f32 %v678_v24  ;;  %2577 = vmatmul.mubr.msk.bf16.gmra.mrb[112].mxu0 %vm525_vm1, %v2750_v21 }
  0xfe   : > { %v3664_v28 = vpop.eup %2777  ;;  %2789 = vtanh.f32 %v680_v26  ;;  %951 = vmatprep.mubr.bf16.mxu0 %v3351_v4 }
  0xff   : > { %v3667_v29 = vpop.eup %2779 }
 0x100   : > { %v2782_v30 = vpop.eup %2781  ;;  %v683_v31 = vpop.f32.mrb[8].mxu0  ;;  %v1110_v32 = vpack.c.bf16 %v3667_v29, %v3661_v27 }
 0x101   : > { %v684_v33 = vadd.f32 %v683_v31, %v3642_v7  ;;  %v685_v34 = vpop.f32.mrb[9].mxu0  ;;  %v1111_v36 = vpack.c.bf16 %v2782_v30, %v3664_v28 }
 0x102   : > { %v686_v37 = vadd.f32 %v685_v34, %v3646_v8  ;;  %v687_v38 = vpop.f32.mrb[10].mxu0 }
 0x103   : > { %2791 = vtanh.f32 %v684_v33  ;;  %v688_v39 = vadd.f32 %v687_v38, %v3642_v7  ;;  %v689_v40 = vpop.f32.mrb[11].mxu0 }
 0x104   : > { %2793 = vtanh.f32 %v686_v37  ;;  %v690_v41 = vadd.f32 %v689_v40, %v3646_v8 }
 0x105   : > { %v3677_v42 = vpop.eup %2783  ;;  %2795 = vtanh.f32 %v688_v39  ;;  %2578 = vmatmul.mubr.msk.bf16.gmra.mrb[116].mxu0 %vm525_vm1, %v2756_v35 }
 0x106   : > { %v3680_v43 = vpop.eup %2785  ;;  %2797 = vtanh.f32 %v690_v41  ;;  %961 = vmatprep.mubr.bf16.mxu0 %v3351_v4 }
 0x107   : > { %v3683_v44 = vpop.eup %2787 }
 0x108   : > { %v2790_v45 = vpop.eup %2789  ;;  %v693_v46 = vpop.f32.mrb[12].mxu0  ;;  %v1112_v47 = vpack.c.bf16 %v3683_v44, %v3677_v42 }
 0x109   : > { %v694_v48 = vadd.f32 %v693_v46, %v3642_v7  ;;  %v695_v49 = vpop.f32.mrb[13].mxu0  ;;  %v1113_v51 = vpack.c.bf16 %v2790_v45, %v3680_v43 }
 0x10a   : > { %v696_v52 = vadd.f32 %v695_v49, %v3646_v8  ;;  %v697_v53 = vpop.f32.mrb[14].mxu0 }
 0x10b   : > { %2799 = vtanh.f32 %v694_v48  ;;  %v698_v54 = vadd.f32 %v697_v53, %v3642_v7  ;;  %v699_v55 = vpop.f32.mrb[15].mxu0 }
 0x10c   : > { %2801 = vtanh.f32 %v696_v52  ;;  %v700_v56 = vadd.f32 %v699_v55, %v3646_v8 }
 0x10d   : > { %v3693_v57 = vpop.eup %2791  ;;  %2803 = vtanh.f32 %v698_v54  ;;  %2579 = vmatmul.mubr.msk.bf16.gmra.mrb[120].mxu0 %vm525_vm1, %v2763_v50 }
 0x10e   : > { %v3696_v58 = vpop.eup %2793  ;;  %2805 = vtanh.f32 %v700_v56  ;;  %971 = vmatprep.mubr.bf16.mxu0 %v3351_v4 }
 0x10f   : > { %v3699_v59 = vpop.eup %2795 }
 0x110   : > { %v3701_v60 = vpop.eup %2797  ;;  %v703_v61 = vpop.f32.mrb[16].mxu0  ;;  %v1114_v62 = vpack.c.bf16 %v3699_v59, %v3693_v57 }
 0x111   : > { %v704_v63 = vadd.f32 %v703_v61, %v3642_v7  ;;  %v705_v2 = vpop.f32.mrb[17].mxu0  ;;  %v1115_v9 = vpack.c.bf16 %v3701_v60, %v3696_v58 }
 0x112   : > { %v706_v10 = vadd.f32 %v705_v2, %v3646_v8  ;;  %v707_v11 = vpop.f32.mrb[18].mxu0 }
 0x113   : > { %2807 = vtanh.f32 %v704_v63  ;;  %v708_v4 = vadd.f32 %v707_v11, %v3642_v7  ;;  %v709_v12 = vpop.f32.mrb[19].mxu0 }
 0x114   : > { %2809 = vtanh.f32 %v706_v10  ;;  %v710_v13 = vadd.f32 %v709_v12, %v3646_v8 }
 0x115   : > { %v2800_v14 = vpop.eup %2799  ;;  %2811 = vtanh.f32 %v708_v4  ;;  %2580 = vmatmul.mubr.msk.bf16.gmra.mrb[124].mxu0 %vm525_vm1, %v2770_v5 }
 0x116   : > { %v2802_v15 = vpop.eup %2801  ;;  %2813 = vtanh.f32 %v710_v13  ;;  %1410 = vmatprep.mubr.bf16.mxu0 %v1111_v36 }
 0x117   : > { %v2804_v16 = vpop.eup %2803 }
 0x118   : > { %v2806_v17 = vpop.eup %2805  ;;  %v713_v18 = vpop.f32.mrb[20].mxu0  ;;  %v1116_v19 = vpack.c.bf16 %v2804_v16, %v2800_v14 }
 0x119   : > { %v714_v20 = vadd.f32 %v713_v18, %v3642_v7  ;;  %v715_v21 = vpop.f32.mrb[21].mxu0  ;;  %v1117_v22 = vpack.c.bf16 %v2806_v17, %v2802_v15 }
 0x11a   : > { %v716_v23 = vadd.f32 %v715_v21, %v3646_v8  ;;  %v717_v24 = vpop.f32.mrb[22].mxu0 }
 0x11b   : > { %2815 = vtanh.f32 %v714_v20  ;;  %v718_v25 = vadd.f32 %v717_v24, %v3642_v7  ;;  %v719_v26 = vpop.f32.mrb[23].mxu0  ;;  %1440 = vmatprep.mubr.bf16.mxu1 %v1117_v22 }
 0x11c   : > { %2817 = vtanh.f32 %v716_v23  ;;  %v720_v28 = vadd.f32 %v719_v26, %v3646_v8  ;;  %1441 = vmatmul.mubr.bf16.vlgmr.msra.gmra.mrb[0].mxu1 %v1116_v19 }
 0x11d   : > { %v2808_v30 = vpop.eup %2807  ;;  %2819 = vtanh.f32 %v718_v25  ;;  %1411 = vmatmul.mubr.bf16.vlgmr.msra.gmra.mrb[128].mxu0 %v1110_v32 }
 0x11e   : > { %v2810_v31 = vpop.eup %2809  ;;  %2821 = vtanh.f32 %v720_v28  ;;  %1420 = vmatprep.mubr.bf16.mxu0 %v1113_v51 }
 0x11f   : > { %v2812_v33 = vpop.eup %2811 }
 0x120   : > { %v2814_v34 = vpop.eup %2813  ;;  %v723_v35 = vpop.f32.mrb[24].mxu0  ;;  %v1118_v36 = vpack.c.bf16 %v2812_v33, %v2808_v30 }
 0x121   : > { %v724_v37 = vadd.f32 %v723_v35, %v3642_v7  ;;  %v725_v38 = vpop.f32.mrb[25].mxu0  ;;  %v1119_v39 = vpack.c.bf16 %v2814_v34, %v2810_v31 }
 0x122   : > { %v726_v40 = vadd.f32 %v725_v38, %v3646_v8  ;;  %v727_v41 = vpop.f32.mrb[26].mxu0 }
 0x123   : > { %2823 = vtanh.f32 %v724_v37  ;;  %v728_v43 = vadd.f32 %v727_v41, %v3642_v7  ;;  %v729_v45 = vpop.f32.mrb[27].mxu0  ;;  %1450 = vmatprep.mubr.bf16.mxu1 %v1119_v39 }
 0x124   : > { %2825 = vtanh.f32 %v726_v40  ;;  %v730_v27 = vadd.f32 %v729_v45, %v3646_v8  ;;  %1451 = vmatmul.mubr.bf16.gmra.mrb[4].mxu1 %v1118_v36 }
 0x125   : > { %v2816_v29 = vpop.eup %2815  ;;  %2827 = vtanh.f32 %v728_v43  ;;  %1421 = vmatmul.mubr.bf16.gmra.mrb[132].mxu0 %v1112_v47 }
 0x126   : > { %v2818_v32 = vpop.eup %2817  ;;  %2829 = vtanh.f32 %v730_v27  ;;  %1430 = vmatprep.mubr.bf16.mxu0 %v1115_v9 }
 0x127   : > { %v2820_v46 = vpop.eup %2819 }
 0x128   : > { %v2822_v48 = vpop.eup %2821  ;;  %v733_v49 = vpop.f32.mrb[28].mxu0  ;;  %v1120_v50 = vpack.c.bf16 %v2820_v46, %v2816_v29 }
 0x129   : > { %v734_v51 = vadd.f32 %v733_v49, %v3642_v7  ;;  %v735_v52 = vpop.f32.mrb[29].mxu0  ;;  %v1121_v53 = vpack.c.bf16 %v2822_v48, %v2818_v32 }
 0x12a   : > { %v736_v54 = vadd.f32 %v735_v52, %v3646_v8  ;;  %v737_v55 = vpop.f32.mrb[30].mxu0 }
 0x12b   : > { %2831 = vtanh.f32 %v734_v51  ;;  %v738_v56 = vadd.f32 %v737_v55, %v3642_v7  ;;  %v739_v58 = vpop.f32.mrb[31].mxu0  ;;  %1460 = vmatprep.mubr.bf16.mxu1 %v1121_v53 }
 0x12c   : > { %2833 = vtanh.f32 %v736_v54  ;;  %v740_v42 = vadd.f32 %v739_v58, %v3646_v8  ;;  %1461 = vmatmul.mubr.bf16.gmra.mrb[8].mxu1 %v1120_v50 }
 0x12d   : > { %v2824_v44 = vpop.eup %2823  ;;  %2835 = vtanh.f32 %v738_v56  ;;  %1431 = vmatmul.mubr.bf16.gmra.mrb[136].mxu0 %v1114_v62 }
 0x12e   : > { %v2826_v47 = vpop.eup %2825  ;;  %2837 = vtanh.f32 %v740_v42 }
 0x12f   : > { %v2828_v60 = vpop.eup %2827 }
 0x130   : > { %v2830_v61 = vpop.eup %2829  ;;  %v743_v63 = vpop.f32.mrb[32].mxu0  ;;  %v1122_v2 = vpack.c.bf16 %v2828_v60, %v2824_v44 }
 0x131   : > { %v744_v5 = vadd.f32 %v743_v63, %v3642_v7  ;;  %v745_v9 = vpop.f32.mrb[33].mxu0  ;;  %v1123_v10 = vpack.c.bf16 %v2830_v61, %v2826_v47 }
 0x132   : > { %v746_v11 = vadd.f32 %v745_v9, %v3646_v8  ;;  %v747_v4 = vpop.f32.mrb[34].mxu0 }
 0x133   : > { %2839 = vtanh.f32 %v744_v5  ;;  %v748_v12 = vadd.f32 %v747_v4, %v3642_v7  ;;  %v749_v13 = vpop.f32.mrb[35].mxu0  ;;  %1470 = vmatprep.mubr.bf16.mxu1 %v1123_v10 }
 0x134   : > { %2841 = vtanh.f32 %v746_v11  ;;  %v750_v57 = vadd.f32 %v749_v13, %v3646_v8  ;;  %1471 = vmatmul.mubr.bf16.gmra.mrb[12].mxu1 %v1122_v2 }
 0x135   : > { %v2832_v59 = vpop.eup %2831  ;;  %2843 = vtanh.f32 %v748_v12 }
 0x136   : > { %v2834_v62 = vpop.eup %2833  ;;  %2845 = vtanh.f32 %v750_v57 }
 0x137   : > { %v2836_v14 = vpop.eup %2835 }
 0x138   : > { %v2838_v15 = vpop.eup %2837  ;;  %v753_v16 = vpop.f32.mrb[36].mxu0  ;;  %v1124_v17 = vpack.c.bf16 %v2836_v14, %v2832_v59 }
 0x139   : > { %v754_v18 = vadd.f32 %v753_v16, %v3642_v7  ;;  %v755_v19 = vpop.f32.mrb[37].mxu0  ;;  %v1125_v20 = vpack.c.bf16 %v2838_v15, %v2834_v62 }
 0x13a   : > { %v756_v21 = vadd.f32 %v755_v19, %v3646_v8  ;;  %v757_v22 = vpop.f32.mrb[38].mxu0 }
 0x13b   : > { %2847 = vtanh.f32 %v754_v18  ;;  %v758_v23 = vadd.f32 %v757_v22, %v3642_v7  ;;  %v759_v24 = vpop.f32.mrb[39].mxu0  ;;  %1480 = vmatprep.mubr.bf16.mxu1 %v1125_v20 }
 0x13c   : > { %2849 = vtanh.f32 %v756_v21  ;;  %v760_v25 = vadd.f32 %v759_v24, %v3646_v8  ;;  %1481 = vmatmul.mubr.bf16.gmra.mrb[16].mxu1 %v1124_v17 }
 0x13d   : > { %v2840_v26 = vpop.eup %2839  ;;  %2851 = vtanh.f32 %v758_v23 }
 0x13e   : > { %v2842_v28 = vpop.eup %2841  ;;  %2853 = vtanh.f32 %v760_v25 }
 0x13f   : > { %v2844_v30 = vpop.eup %2843 }
 0x140   : > { %v2846_v31 = vpop.eup %2845  ;;  %v763_v33 = vpop.f32.mrb[40].mxu0  ;;  %v1126_v34 = vpack.c.bf16 %v2844_v30, %v2840_v26 }
 0x141   : > { %v764_v35 = vadd.f32 %v763_v33, %v3642_v7  ;;  %v765_v36 = vpop.f32.mrb[41].mxu0  ;;  %v1127_v37 = vpack.c.bf16 %v2846_v31, %v2842_v28 }
 0x142   : > { %v766_v38 = vadd.f32 %v765_v36, %v3646_v8  ;;  %v767_v39 = vpop.f32.mrb[42].mxu0 }
 0x143   : > { %2855 = vtanh.f32 %v764_v35  ;;  %v768_v40 = vadd.f32 %v767_v39, %v3642_v7  ;;  %v769_v41 = vpop.f32.mrb[43].mxu0  ;;  %1490 = vmatprep.mubr.bf16.mxu1 %v1127_v37 }
 0x144   : > { %2857 = vtanh.f32 %v766_v38  ;;  %v770_v43 = vadd.f32 %v769_v41, %v3646_v8  ;;  %1491 = vmatmul.mubr.bf16.gmra.mrb[20].mxu1 %v1126_v34 }
 0x145   : > { %v2848_v45 = vpop.eup %2847  ;;  %2859 = vtanh.f32 %v768_v40 }
 0x146   : > { %v2850_v27 = vpop.eup %2849  ;;  %2861 = vtanh.f32 %v770_v43 }
 0x147   : > { %v2852_v29 = vpop.eup %2851 }
 0x148   : > { %v2854_v32 = vpop.eup %2853  ;;  %v773_v46 = vpop.f32.mrb[44].mxu0  ;;  %v1128_v48 = vpack.c.bf16 %v2852_v29, %v2848_v45 }
 0x149   : > { %v774_v49 = vadd.f32 %v773_v46, %v3642_v7  ;;  %v775_v50 = vpop.f32.mrb[45].mxu0  ;;  %v1129_v51 = vpack.c.bf16 %v2854_v32, %v2850_v27 }
 0x14a   : > { %v776_v52 = vadd.f32 %v775_v50, %v3646_v8  ;;  %v777_v53 = vpop.f32.mrb[46].mxu0 }
 0x14b   : > { %2863 = vtanh.f32 %v774_v49  ;;  %v778_v54 = vadd.f32 %v777_v53, %v3642_v7  ;;  %v779_v55 = vpop.f32.mrb[47].mxu0  ;;  %1500 = vmatprep.mubr.bf16.mxu1 %v1129_v51 }
 0x14c   : > { %2865 = vtanh.f32 %v776_v52  ;;  %v780_v56 = vadd.f32 %v779_v55, %v3646_v8  ;;  %1501 = vmatmul.mubr.bf16.gmra.mrb[24].mxu1 %v1128_v48 }
 0x14d   : > { %v2856_v58 = vpop.eup %2855  ;;  %2867 = vtanh.f32 %v778_v54 }
 0x14e   : > { %v2858_v42 = vpop.eup %2857  ;;  %2869 = vtanh.f32 %v780_v56 }
 0x14f   : > { %v2860_v44 = vpop.eup %2859 }
 0x150   : > { %v2862_v47 = vpop.eup %2861  ;;  %v783_v60 = vpop.f32.mrb[48].mxu0  ;;  %v1130_v61 = vpack.c.bf16 %v2860_v44, %v2856_v58 }
 0x151   : > { %v784_v63 = vadd.f32 %v783_v60, %v3642_v7  ;;  %v785_v2 = vpop.f32.mrb[49].mxu0  ;;  %v1131_v5 = vpack.c.bf16 %v2862_v47, %v2858_v42 }
 0x152   : > { %v786_v9 = vadd.f32 %v785_v2, %v3646_v8  ;;  %v787_v10 = vpop.f32.mrb[50].mxu0 }
 0x153   : > { %2871 = vtanh.f32 %v784_v63  ;;  %v788_v11 = vadd.f32 %v787_v10, %v3642_v7  ;;  %v789_v4 = vpop.f32.mrb[51].mxu0  ;;  %1510 = vmatprep.mubr.bf16.mxu1 %v1131_v5 }
 0x154   : > { %2873 = vtanh.f32 %v786_v9  ;;  %v790_v12 = vadd.f32 %v789_v4, %v3646_v8  ;;  %1511 = vmatmul.mubr.bf16.gmra.mrb[28].mxu1 %v1130_v61 }
 0x155   : > { %v2864_v13 = vpop.eup %2863  ;;  %2875 = vtanh.f32 %v788_v11 }
 0x156   : > { %v2866_v57 = vpop.eup %2865  ;;  %2877 = vtanh.f32 %v790_v12 }
 0x157   : > { %v2868_v59 = vpop.eup %2867 }
 0x158   : > { %v2870_v62 = vpop.eup %2869  ;;  %v793_v14 = vpop.f32.mrb[52].mxu0  ;;  %v1132_v15 = vpack.c.bf16 %v2868_v59, %v2864_v13 }
 0x159   : > { %v794_v16 = vadd.f32 %v793_v14, %v3642_v7  ;;  %v795_v17 = vpop.f32.mrb[53].mxu0  ;;  %v1133_v18 = vpack.c.bf16 %v2870_v62, %v2866_v57 }
 0x15a   : > { %v796_v19 = vadd.f32 %v795_v17, %v3646_v8  ;;  %v797_v20 = vpop.f32.mrb[54].mxu0 }
 0x15b   : > { %2879 = vtanh.f32 %v794_v16  ;;  %v798_v21 = vadd.f32 %v797_v20, %v3642_v7  ;;  %v799_v22 = vpop.f32.mrb[55].mxu0  ;;  %1520 = vmatprep.mubr.bf16.mxu1 %v1133_v18 }
 0x15c   : > { %2881 = vtanh.f32 %v796_v19  ;;  %v800_v23 = vadd.f32 %v799_v22, %v3646_v8  ;;  %1521 = vmatmul.mubr.bf16.gmra.mrb[32].mxu1 %v1132_v15 }
 0x15d   : > { %v2872_v24 = vpop.eup %2871  ;;  %2883 = vtanh.f32 %v798_v21 }
 0x15e   : > { %v2874_v25 = vpop.eup %2873  ;;  %2885 = vtanh.f32 %v800_v23 }
 0x15f   : > { %v2876_v26 = vpop.eup %2875 }
 0x160   : > { %v2878_v28 = vpop.eup %2877  ;;  %v803_v30 = vpop.f32.mrb[56].mxu0  ;;  %v1134_v31 = vpack.c.bf16 %v2876_v26, %v2872_v24 }
 0x161   : > { %v804_v33 = vadd.f32 %v803_v30, %v3642_v7  ;;  %v805_v34 = vpop.f32.mrb[57].mxu0  ;;  %v1135_v35 = vpack.c.bf16 %v2878_v28, %v2874_v25 }
 0x162   : > { %v806_v36 = vadd.f32 %v805_v34, %v3646_v8  ;;  %v807_v37 = vpop.f32.mrb[58].mxu0 }
 0x163   : > { %2887 = vtanh.f32 %v804_v33  ;;  %v808_v38 = vadd.f32 %v807_v37, %v3642_v7  ;;  %v809_v39 = vpop.f32.mrb[59].mxu0  ;;  %1530 = vmatprep.mubr.bf16.mxu1 %v1135_v35 }
 0x164   : > { %2889 = vtanh.f32 %v806_v36  ;;  %v810_v40 = vadd.f32 %v809_v39, %v3646_v8  ;;  %1531 = vmatmul.mubr.bf16.gmra.mrb[36].mxu1 %v1134_v31 }
 0x165   : > { %v2880_v41 = vpop.eup %2879  ;;  %2891 = vtanh.f32 %v808_v38 }
 0x166   : > { %v2882_v43 = vpop.eup %2881  ;;  %2893 = vtanh.f32 %v810_v40 }
 0x167   : > { %v2884_v45 = vpop.eup %2883 }
 0x168   : > { %v2886_v27 = vpop.eup %2885  ;;  %v813_v29 = vpop.f32.mrb[60].mxu0  ;;  %v1136_v32 = vpack.c.bf16 %v2884_v45, %v2880_v41 }
 0x169   : > { %v814_v46 = vadd.f32 %v813_v29, %v3642_v7  ;;  %v815_v48 = vpop.f32.mrb[61].mxu0  ;;  %v1137_v49 = vpack.c.bf16 %v2886_v27, %v2882_v43 }
 0x16a   : > { %v816_v50 = vadd.f32 %v815_v48, %v3646_v8  ;;  %v817_v51 = vpop.f32.mrb[62].mxu0 }
 0x16b   : > { %2895 = vtanh.f32 %v814_v46  ;;  %v818_v52 = vadd.f32 %v817_v51, %v3642_v7  ;;  %v819_v53 = vpop.f32.mrb[63].mxu0  ;;  %1540 = vmatprep.mubr.bf16.mxu1 %v1137_v49 }
 0x16c   : > { %2897 = vtanh.f32 %v816_v50  ;;  %v820_v54 = vadd.f32 %v819_v53, %v3646_v8  ;;  %1541 = vmatmul.mubr.bf16.gmra.mrb[40].mxu1 %v1136_v32 }
 0x16d   : > { %v2888_v55 = vpop.eup %2887  ;;  %2899 = vtanh.f32 %v818_v52 }
 0x16e   : > { %v2890_v56 = vpop.eup %2889  ;;  %2901 = vtanh.f32 %v820_v54 }
 0x16f   : > { %v2892_v58 = vpop.eup %2891 }
 0x170   : > { %v2894_v42 = vpop.eup %2893  ;;  %v823_v44 = vpop.f32.mrb[64].mxu0  ;;  %v1138_v47 = vpack.c.bf16 %v2892_v58, %v2888_v55 }
 0x171   : > { %v824_v60 = vadd.f32 %v823_v44, %v3642_v7  ;;  %v825_v61 = vpop.f32.mrb[65].mxu0  ;;  %v1139_v63 = vpack.c.bf16 %v2894_v42, %v2890_v56 }
 0x172   : > { %v826_v2 = vadd.f32 %v825_v61, %v3646_v8  ;;  %v827_v5 = vpop.f32.mrb[66].mxu0 }
 0x173   : > { %2903 = vtanh.f32 %v824_v60  ;;  %v828_v9 = vadd.f32 %v827_v5, %v3642_v7  ;;  %v829_v10 = vpop.f32.mrb[67].mxu0  ;;  %1550 = vmatprep.mubr.bf16.mxu1 %v1139_v63 }
 0x174   : > { %2905 = vtanh.f32 %v826_v2  ;;  %v830_v11 = vadd.f32 %v829_v10, %v3646_v8  ;;  %1551 = vmatmul.mubr.bf16.gmra.mrb[44].mxu1 %v1138_v47 }
 0x175   : > { %v2896_v4 = vpop.eup %2895  ;;  %2907 = vtanh.f32 %v828_v9 }
 0x176   : > { %v2898_v12 = vpop.eup %2897  ;;  %2909 = vtanh.f32 %v830_v11 }
 0x177   : > { %v2900_v13 = vpop.eup %2899 }
 0x178   : > { %v2902_v57 = vpop.eup %2901  ;;  %v833_v59 = vpop.f32.mrb[68].mxu0  ;;  %v1140_v62 = vpack.c.bf16 %v2900_v13, %v2896_v4 }
 0x179   : > { %v834_v14 = vadd.f32 %v833_v59, %v3642_v7  ;;  %v835_v15 = vpop.f32.mrb[69].mxu0  ;;  %v1141_v16 = vpack.c.bf16 %v2902_v57, %v2898_v12 }
 0x17a   : > { %v836_v17 = vadd.f32 %v835_v15, %v3646_v8  ;;  %v837_v18 = vpop.f32.mrb[70].mxu0 }
 0x17b   : > { %2911 = vtanh.f32 %v834_v14  ;;  %v838_v19 = vadd.f32 %v837_v18, %v3642_v7  ;;  %v839_v20 = vpop.f32.mrb[71].mxu0  ;;  %1560 = vmatprep.mubr.bf16.mxu1 %v1141_v16 }
 0x17c   : > { %2913 = vtanh.f32 %v836_v17  ;;  %v840_v21 = vadd.f32 %v839_v20, %v3646_v8  ;;  %1561 = vmatmul.mubr.bf16.gmra.mrb[48].mxu1 %v1140_v62 }
 0x17d   : > { %v2904_v22 = vpop.eup %2903  ;;  %2915 = vtanh.f32 %v838_v19 }
 0x17e   : > { %v2906_v23 = vpop.eup %2905  ;;  %2917 = vtanh.f32 %v840_v21 }
 0x17f   : > { %v2908_v24 = vpop.eup %2907 }
 0x180   : > { %v2910_v25 = vpop.eup %2909  ;;  %v843_v26 = vpop.f32.mrb[72].mxu0  ;;  %v1142_v28 = vpack.c.bf16 %v2908_v24, %v2904_v22 }
 0x181   : > { %v844_v30 = vadd.f32 %v843_v26, %v3642_v7  ;;  %v845_v31 = vpop.f32.mrb[73].mxu0  ;;  %v1143_v33 = vpack.c.bf16 %v2910_v25, %v2906_v23 }
 0x182   : > { %v846_v34 = vadd.f32 %v845_v31, %v3646_v8  ;;  %v847_v35 = vpop.f32.mrb[74].mxu0 }
 0x183   : > { %2919 = vtanh.f32 %v844_v30  ;;  %v848_v36 = vadd.f32 %v847_v35, %v3642_v7  ;;  %v849_v37 = vpop.f32.mrb[75].mxu0  ;;  %1570 = vmatprep.mubr.bf16.mxu1 %v1143_v33 }
 0x184   : > { %2921 = vtanh.f32 %v846_v34  ;;  %v850_v38 = vadd.f32 %v849_v37, %v3646_v8  ;;  %1571 = vmatmul.mubr.bf16.gmra.mrb[52].mxu1 %v1142_v28 }
 0x185   : > { %v2912_v39 = vpop.eup %2911  ;;  %2923 = vtanh.f32 %v848_v36 }
 0x186   : > { %v2914_v40 = vpop.eup %2913  ;;  %2925 = vtanh.f32 %v850_v38 }
 0x187   : > { %v2916_v41 = vpop.eup %2915 }
 0x188   : > { %v2918_v43 = vpop.eup %2917  ;;  %v853_v45 = vpop.f32.mrb[76].mxu0  ;;  %v1144_v27 = vpack.c.bf16 %v2916_v41, %v2912_v39 }
 0x189   : > { %v854_v29 = vadd.f32 %v853_v45, %v3642_v7  ;;  %v855_v32 = vpop.f32.mrb[77].mxu0  ;;  %v1145_v46 = vpack.c.bf16 %v2918_v43, %v2914_v40 }
 0x18a   : > { %v856_v48 = vadd.f32 %v855_v32, %v3646_v8  ;;  %v857_v49 = vpop.f32.mrb[78].mxu0 }
 0x18b   : > { %2927 = vtanh.f32 %v854_v29  ;;  %v858_v50 = vadd.f32 %v857_v49, %v3642_v7  ;;  %v859_v51 = vpop.f32.mrb[79].mxu0  ;;  %1580 = vmatprep.mubr.bf16.mxu1 %v1145_v46 }
 0x18c   : > { %2929 = vtanh.f32 %v856_v48  ;;  %v860_v52 = vadd.f32 %v859_v51, %v3646_v8  ;;  %1581 = vmatmul.mubr.bf16.gmra.mrb[56].mxu1 %v1144_v27 }
 0x18d   : > { %v2920_v53 = vpop.eup %2919  ;;  %2931 = vtanh.f32 %v858_v50 }
 0x18e   : > { %v2922_v54 = vpop.eup %2921  ;;  %2933 = vtanh.f32 %v860_v52 }
 0x18f   : > { %v2924_v55 = vpop.eup %2923 }
 0x190   : > { %v2926_v56 = vpop.eup %2925  ;;  %v863_v58 = vpop.f32.mrb[80].mxu0  ;;  %v1146_v42 = vpack.c.bf16 %v2924_v55, %v2920_v53 }
 0x191   : > { %v864_v44 = vadd.f32 %v863_v58, %v3642_v7  ;;  %v865_v47 = vpop.f32.mrb[81].mxu0  ;;  %v1147_v60 = vpack.c.bf16 %v2926_v56, %v2922_v54 }
 0x192   : > { %v866_v61 = vadd.f32 %v865_v47, %v3646_v8  ;;  %v867_v63 = vpop.f32.mrb[82].mxu0 }
 0x193   : > { %2935 = vtanh.f32 %v864_v44  ;;  %v868_v2 = vadd.f32 %v867_v63, %v3642_v7  ;;  %v869_v5 = vpop.f32.mrb[83].mxu0  ;;  %1590 = vmatprep.mubr.bf16.mxu1 %v1147_v60 }
 0x194   : > { %2937 = vtanh.f32 %v866_v61  ;;  %v870_v9 = vadd.f32 %v869_v5, %v3646_v8  ;;  %1591 = vmatmul.mubr.bf16.gmra.mrb[60].mxu1 %v1146_v42 }
 0x195   : > { %v2928_v10 = vpop.eup %2927  ;;  %2939 = vtanh.f32 %v868_v2 }
 0x196   : > { %v2930_v11 = vpop.eup %2929  ;;  %2941 = vtanh.f32 %v870_v9 }
 0x197   : > { %v2932_v4 = vpop.eup %2931 }
 0x198   : > { %v2934_v12 = vpop.eup %2933  ;;  %v873_v13 = vpop.f32.mrb[84].mxu0  ;;  %v1148_v57 = vpack.c.bf16 %v2932_v4, %v2928_v10 }
 0x199   : > { %v874_v59 = vadd.f32 %v873_v13, %v3642_v7  ;;  %v875_v62 = vpop.f32.mrb[85].mxu0  ;;  %v1149_v14 = vpack.c.bf16 %v2934_v12, %v2930_v11 }
 0x19a   : > { %v876_v15 = vadd.f32 %v875_v62, %v3646_v8  ;;  %v877_v16 = vpop.f32.mrb[86].mxu0 }
 0x19b   : > { %2943 = vtanh.f32 %v874_v59  ;;  %v878_v17 = vadd.f32 %v877_v16, %v3642_v7  ;;  %v879_v18 = vpop.f32.mrb[87].mxu0  ;;  %1600 = vmatprep.mubr.bf16.mxu1 %v1149_v14 }
 0x19c   : > { %2945 = vtanh.f32 %v876_v15  ;;  %v880_v19 = vadd.f32 %v879_v18, %v3646_v8  ;;  %1601 = vmatmul.mubr.bf16.gmra.mrb[64].mxu1 %v1148_v57 }
 0x19d   : > { %v2936_v20 = vpop.eup %2935  ;;  %2947 = vtanh.f32 %v878_v17 }
 0x19e   : > { %v2938_v21 = vpop.eup %2937  ;;  %2949 = vtanh.f32 %v880_v19 }
 0x19f   : > { %v2940_v22 = vpop.eup %2939 }
 0x1a0   : > { %v2942_v23 = vpop.eup %2941  ;;  %v883_v24 = vpop.f32.mrb[88].mxu0  ;;  %v1150_v25 = vpack.c.bf16 %v2940_v22, %v2936_v20 }
 0x1a1   : > { %v884_v26 = vadd.f32 %v883_v24, %v3642_v7  ;;  %v885_v28 = vpop.f32.mrb[89].mxu0  ;;  %v1151_v30 = vpack.c.bf16 %v2942_v23, %v2938_v21 }
 0x1a2   : > { %v886_v31 = vadd.f32 %v885_v28, %v3646_v8  ;;  %v887_v33 = vpop.f32.mrb[90].mxu0 }
 0x1a3   : > { %2951 = vtanh.f32 %v884_v26  ;;  %v888_v34 = vadd.f32 %v887_v33, %v3642_v7  ;;  %v889_v35 = vpop.f32.mrb[91].mxu0  ;;  %1610 = vmatprep.mubr.bf16.mxu1 %v1151_v30 }
 0x1a4   : > { %2953 = vtanh.f32 %v886_v31  ;;  %v890_v36 = vadd.f32 %v889_v35, %v3646_v8  ;;  %1611 = vmatmul.mubr.bf16.gmra.mrb[68].mxu1 %v1150_v25 }
 0x1a5   : > { %v2944_v37 = vpop.eup %2943  ;;  %2955 = vtanh.f32 %v888_v34 }
 0x1a6   : > { %v2946_v38 = vpop.eup %2945  ;;  %2957 = vtanh.f32 %v890_v36 }
 0x1a7   : > { %v2948_v39 = vpop.eup %2947 }
 0x1a8   : > { %v2950_v40 = vpop.eup %2949  ;;  %v893_v41 = vpop.f32.mrb[92].mxu0  ;;  %v1152_v43 = vpack.c.bf16 %v2948_v39, %v2944_v37 }
 0x1a9   : > { %v894_v45 = vadd.f32 %v893_v41, %v3642_v7  ;;  %v895_v27 = vpop.f32.mrb[93].mxu0  ;;  %v1153_v29 = vpack.c.bf16 %v2950_v40, %v2946_v38 }
 0x1aa   : > { %v896_v32 = vadd.f32 %v895_v27, %v3646_v8  ;;  %v897_v46 = vpop.f32.mrb[94].mxu0 }
 0x1ab   : > { %2959 = vtanh.f32 %v894_v45  ;;  %v898_v48 = vadd.f32 %v897_v46, %v3642_v7  ;;  %v899_v49 = vpop.f32.mrb[95].mxu0  ;;  %1620 = vmatprep.mubr.bf16.mxu1 %v1153_v29 }
 0x1ac   : > { %2961 = vtanh.f32 %v896_v32  ;;  %v900_v50 = vadd.f32 %v899_v49, %v3646_v8  ;;  %1621 = vmatmul.mubr.bf16.gmra.mrb[72].mxu1 %v1152_v43 }
 0x1ad   : > { %v2952_v51 = vpop.eup %2951  ;;  %2963 = vtanh.f32 %v898_v48 }
 0x1ae   : > { %v2954_v52 = vpop.eup %2953  ;;  %2965 = vtanh.f32 %v900_v50 }
 0x1af   : > { %v2956_v53 = vpop.eup %2955 }
 0x1b0   : > { %v2958_v54 = vpop.eup %2957  ;;  %v903_v55 = vpop.f32.mrb[96].mxu0  ;;  %v1154_v56 = vpack.c.bf16 %v2956_v53, %v2952_v51 }
 0x1b1   : > { %v904_v58 = vadd.f32 %v903_v55, %v3642_v7  ;;  %v905_v42 = vpop.f32.mrb[97].mxu0  ;;  %v1155_v44 = vpack.c.bf16 %v2958_v54, %v2954_v52 }
 0x1b2   : > { %v906_v47 = vadd.f32 %v905_v42, %v3646_v8  ;;  %v907_v60 = vpop.f32.mrb[98].mxu0 }
 0x1b3   : > { %2967 = vtanh.f32 %v904_v58  ;;  %v908_v61 = vadd.f32 %v907_v60, %v3642_v7  ;;  %v909_v63 = vpop.f32.mrb[99].mxu0  ;;  %1630 = vmatprep.mubr.bf16.mxu1 %v1155_v44 }
 0x1b4   : > { %2969 = vtanh.f32 %v906_v47  ;;  %v910_v2 = vadd.f32 %v909_v63, %v3646_v8  ;;  %1631 = vmatmul.mubr.bf16.gmra.mrb[76].mxu1 %v1154_v56 }
 0x1b5   : > { %v2960_v5 = vpop.eup %2959  ;;  %2971 = vtanh.f32 %v908_v61 }
 0x1b6   : > { %v2962_v9 = vpop.eup %2961  ;;  %2973 = vtanh.f32 %v910_v2 }
 0x1b7   : > { %v2964_v10 = vpop.eup %2963 }
 0x1b8   : > { %v2966_v11 = vpop.eup %2965  ;;  %v913_v4 = vpop.f32.mrb[100].mxu0  ;;  %v1156_v12 = vpack.c.bf16 %v2964_v10, %v2960_v5 }
 0x1b9   : > { %v914_v13 = vadd.f32 %v913_v4, %v3642_v7  ;;  %v915_v57 = vpop.f32.mrb[101].mxu0  ;;  %v1157_v59 = vpack.c.bf16 %v2966_v11, %v2962_v9 }
 0x1ba   : > { %v916_v62 = vadd.f32 %v915_v57, %v3646_v8  ;;  %v917_v14 = vpop.f32.mrb[102].mxu0 }
 0x1bb   : > { %2975 = vtanh.f32 %v914_v13  ;;  %v918_v15 = vadd.f32 %v917_v14, %v3642_v7  ;;  %v919_v16 = vpop.f32.mrb[103].mxu0  ;;  %1640 = vmatprep.mubr.bf16.mxu1 %v1157_v59 }
 0x1bc   : > { %2977 = vtanh.f32 %v916_v62  ;;  %v920_v17 = vadd.f32 %v919_v16, %v3646_v8  ;;  %1641 = vmatmul.mubr.bf16.gmra.mrb[80].mxu1 %v1156_v12 }
 0x1bd   : > { %v2968_v18 = vpop.eup %2967  ;;  %2979 = vtanh.f32 %v918_v15 }
 0x1be   : > { %v2970_v19 = vpop.eup %2969  ;;  %2981 = vtanh.f32 %v920_v17 }
 0x1bf   : > { %v2972_v20 = vpop.eup %2971 }
 0x1c0   : > { %v2974_v21 = vpop.eup %2973  ;;  %v923_v22 = vpop.f32.mrb[104].mxu0  ;;  %v1158_v23 = vpack.c.bf16 %v2972_v20, %v2968_v18 }
 0x1c1   : > { %v924_v24 = vadd.f32 %v923_v22, %v3642_v7  ;;  %v925_v25 = vpop.f32.mrb[105].mxu0  ;;  %v1159_v26 = vpack.c.bf16 %v2974_v21, %v2970_v19 }
 0x1c2   : > { %v926_v28 = vadd.f32 %v925_v25, %v3646_v8  ;;  %v927_v30 = vpop.f32.mrb[106].mxu0 }
 0x1c3   : > { %2983 = vtanh.f32 %v924_v24  ;;  %v928_v31 = vadd.f32 %v927_v30, %v3642_v7  ;;  %v929_v33 = vpop.f32.mrb[107].mxu0  ;;  %1650 = vmatprep.mubr.bf16.mxu1 %v1159_v26 }
 0x1c4   : > { %2985 = vtanh.f32 %v926_v28  ;;  %v930_v34 = vadd.f32 %v929_v33, %v3646_v8  ;;  %1651 = vmatmul.mubr.bf16.gmra.mrb[84].mxu1 %v1158_v23 }
 0x1c5   : > { %v2976_v35 = vpop.eup %2975  ;;  %2987 = vtanh.f32 %v928_v31 }
 0x1c6   : > { %v2978_v36 = vpop.eup %2977  ;;  %2989 = vtanh.f32 %v930_v34 }
 0x1c7   : > { %v2980_v37 = vpop.eup %2979 }
 0x1c8   : > { %v2982_v38 = vpop.eup %2981  ;;  %v933_v39 = vpop.f32.mrb[108].mxu0  ;;  %v1160_v40 = vpack.c.bf16 %v2980_v37, %v2976_v35 }
 0x1c9   : > { %v934_v41 = vadd.f32 %v933_v39, %v3642_v7  ;;  %v935_v43 = vpop.f32.mrb[109].mxu0  ;;  %v1161_v45 = vpack.c.bf16 %v2982_v38, %v2978_v36 }
 0x1ca   : > { %v936_v27 = vadd.f32 %v935_v43, %v3646_v8  ;;  %v937_v29 = vpop.f32.mrb[110].mxu0  ;;  %v1206_v43 = vld [vmem:[%s4283_s4] sm:$0x3] }
 0x1cb   : > { %2991 = vtanh.f32 %v934_v41  ;;  %v938_v32 = vadd.f32 %v937_v29, %v3642_v7  ;;  %v939_v46 = vpop.f32.mrb[111].mxu0  ;;  %1660 = vmatprep.mubr.bf16.mxu1 %v1161_v45 }
 0x1cc   : > { %2993 = vtanh.f32 %v936_v27  ;;  %v940_v48 = vadd.f32 %v939_v46, %v3646_v8  ;;  %1661 = vmatmul.mubr.bf16.gmra.mrb[88].mxu1 %v1160_v40 }
 0x1cd   : > { %v2984_v49 = vpop.eup %2983  ;;  %2995 = vtanh.f32 %v938_v32 }
 0x1ce   : > { %v2986_v50 = vpop.eup %2985  ;;  %2997 = vtanh.f32 %v940_v48  ;;  %v3834_v48 = vrot.slane %v1206_v43, %v3634_v3 }
 0x1cf   : > { %v2988_v51 = vpop.eup %2987 }
 0x1d0   : > { %v2990_v52 = vpop.eup %2989  ;;  %v943_v53 = vpop.f32.mrb[112].mxu0  ;;  %v1162_v54 = vpack.c.bf16 %v2988_v51, %v2984_v49  ;;  %v1859_v51 = vld [vmem:[%s4284_s5] sm:$0x3] }
 0x1d1   : > { %v944_v55 = vadd.f32 %v943_v53, %v3642_v7  ;;  %v945_v56 = vpop.f32.mrb[113].mxu0  ;;  %v1163_v58 = vpack.c.bf16 %v2990_v52, %v2986_v50  ;;  %v3838_v50 = vrot.slane %v1206_v43, %v356_v6 }
 0x1d2   : > { %v946_v42 = vadd.f32 %v945_v56, %v3646_v8  ;;  %v947_v44 = vpop.f32.mrb[114].mxu0 }
 0x1d3   : > { %2999 = vtanh.f32 %v944_v55  ;;  %v948_v47 = vadd.f32 %v947_v44, %v3642_v7  ;;  %v949_v60 = vpop.f32.mrb[115].mxu0  ;;  %1670 = vmatprep.mubr.bf16.mxu1 %v1163_v58 }
 0x1d4   : > { %3001 = vtanh.f32 %v946_v42  ;;  %v950_v61 = vadd.f32 %v949_v60, %v3646_v8  ;;  %1671 = vmatmul.mubr.bf16.gmra.mrb[92].mxu1 %v1162_v54  ;;  %v1860_v42 = vunpack.c.l.bf16 %v1859_v51 }
 0x1d5   : > { %v2992_v63 = vpop.eup %2991  ;;  %3003 = vtanh.f32 %v948_v47 }
 0x1d6   : > { %v2994_v2 = vpop.eup %2993  ;;  %3005 = vtanh.f32 %v950_v61 }
 0x1d7   : > { %v2996_v5 = vpop.eup %2995 }
 0x1d8   : > { %v2998_v9 = vpop.eup %2997  ;;  %v953_v10 = vpop.f32.mrb[116].mxu0  ;;  %v1164_v11 = vpack.c.bf16 %v2996_v5, %v2992_v63 }
 0x1d9   : > { %v954_v4 = vadd.f32 %v953_v10, %v3642_v7  ;;  %v955_v12 = vpop.f32.mrb[117].mxu0  ;;  %v1165_v13 = vpack.c.bf16 %v2998_v9, %v2994_v2 }
 0x1da   : > { %v956_v57 = vadd.f32 %v955_v12, %v3646_v8  ;;  %v957_v59 = vpop.f32.mrb[118].mxu0 }
 0x1db   : > { %3007 = vtanh.f32 %v954_v4  ;;  %v958_v62 = vadd.f32 %v957_v59, %v3642_v7  ;;  %v959_v14 = vpop.f32.mrb[119].mxu0  ;;  %1680 = vmatprep.mubr.bf16.mxu1 %v1165_v13  ;;  %v1868_v4 = vsub.s32 2, %v3629_v1  ;;  %v1865_v13 = vrot.slane %v1860_v42, %v3634_v3 }
 0x1dc   : > { %3009 = vtanh.f32 %v956_v57  ;;  %v960_v15 = vadd.f32 %v959_v14, %v3646_v8  ;;  %1681 = vmatmul.mubr.bf16.gmra.mrb[96].mxu1 %v1164_v11 }
 0x1dd   : > { %v3000_v16 = vpop.eup %2999  ;;  %3011 = vtanh.f32 %v958_v62 }
 0x1de   : > { %v3002_v17 = vpop.eup %3001  ;;  %3013 = vtanh.f32 %v960_v15 }
 0x1df   : > { %v3004_v18 = vpop.eup %3003 }
 0x1e0   : > { %v3006_v19 = vpop.eup %3005  ;;  %v963_v20 = vpop.f32.mrb[120].mxu0  ;;  %v1166_v21 = vpack.c.bf16 %v3004_v18, %v3000_v16  ;;  %v1869_v16 = vrot.slane %v1860_v42, %v1868_v4 }
 0x1e1   : > { %v964_v22 = vadd.f32 %v963_v20, %v3642_v7  ;;  %v965_v23 = vpop.f32.mrb[121].mxu0  ;;  %v1167_v24 = vpack.c.bf16 %v3006_v19, %v3002_v17 }
 0x1e2   : > { %v966_v25 = vadd.f32 %v965_v23, %v3646_v8  ;;  %v967_v26 = vpop.f32.mrb[122].mxu0 }
 0x1e3   : > { %3015 = vtanh.f32 %v964_v22  ;;  %v968_v28 = vadd.f32 %v967_v26, %v3642_v7  ;;  %v969_v30 = vpop.f32.mrb[123].mxu0  ;;  %1690 = vmatprep.mubr.bf16.mxu1 %v1167_v24  ;;  %v3855_v22 = vrot.slane %v1865_v13, %v3634_v3 }
 0x1e4   : > { %3017 = vtanh.f32 %v966_v25  ;;  %v970_v31 = vadd.f32 %v969_v30, %v3646_v8  ;;  %1691 = vmatmul.mubr.bf16.gmra.mrb[100].mxu1 %v1166_v21 }
 0x1e5   : > { %v3008_v33 = vpop.eup %3007  ;;  %3019 = vtanh.f32 %v968_v28 }
 0x1e6   : > { %v3010_v34 = vpop.eup %3009  ;;  %3021 = vtanh.f32 %v970_v31 }
 0x1e7   : > { %v3012_v35 = vpop.eup %3011 }
 0x1e8   : > { %v3014_v36 = vpop.eup %3013  ;;  %v973_v37 = vpop.f32.mrb[124].mxu0  ;;  %v1168_v38 = vpack.c.bf16 %v3012_v35, %v3008_v33 }
 0x1e9   : > { %v974_v39 = vadd.f32 %v973_v37, %v3642_v7  ;;  %v975_v40 = vpop.f32.mrb[125].mxu0  ;;  %v1169_v41 = vpack.c.bf16 %v3014_v36, %v3010_v34  ;;  %v3863_v37 = vrot.slane %v1869_v16, %v3634_v3 }
 0x1ea   : > { %v976_v45 = vadd.f32 %v975_v40, %v3646_v8  ;;  %v977_v27 = vpop.f32.mrb[126].mxu0 }
 0x1eb   : > { %3023 = vtanh.f32 %v974_v39  ;;  %v978_v29 = vadd.f32 %v977_v27, %v3642_v7  ;;  %v979_v32 = vpop.f32.mrb[127].mxu0  ;;  %1700 = vmatprep.mubr.bf16.mxu1 %v1169_v41 }
 0x1ec   : > { %3025 = vtanh.f32 %v976_v45  ;;  %v980_v46 = vadd.f32 %v979_v32, %v3646_v8  ;;  %1701 = vmatmul.mubr.bf16.gmra.mrb[104].mxu1 %v1168_v38 }
 0x1ed   : > { %v3016_v49 = vpop.eup %3015  ;;  %3027 = vtanh.f32 %v978_v29 }
 0x1ee   : > { %v3018_v7 = vpop.eup %3017  ;;  %3029 = vtanh.f32 %v980_v46 }
 0x1ef   : > { %v3020_v52 = vpop.eup %3019  ;;  %v1442_v53 = vpop.f32.mrb[0].mxu1 }
 0x1f0   : > { %v3022_v54 = vpop.eup %3021  ;;  %v1443_v8 = vadd.f32 %v1442_v53, %v3834_v48  ;;  %v1412_v55 = vpop.f32.mrb[128].mxu0  ;;  %v1170_v58 = vpack.c.bf16 %v3020_v52, %v3016_v49 }
 0x1f1   : > { %v1444_v56 = vpop.f32.mrb[1].mxu1  ;;  %v1413_v44 = vadd.f32 %v1412_v55, %v3834_v48  ;;  %v1414_v47 = vpop.f32.mrb[129].mxu0  ;;  %v1171_v61 = vpack.c.bf16 %v3022_v54, %v3018_v7 }
 0x1f2   : > { %v1445_v6 = vadd.f32 %v1444_v56, %v3838_v50  ;;  %v1446_v60 = vpop.f32.mrb[2].mxu1  ;;  %3031 = vtanh.f32 %v1443_v8  ;;  %v1415_v63 = vadd.f32 %v1414_v47, %v3838_v50  ;;  %v1416_v5 = vpop.f32.mrb[130].mxu0 }
 0x1f3   : > { %v1447_v2 = vadd.f32 %v1446_v60, %v3834_v48  ;;  %v1448_v9 = vpop.f32.mrb[3].mxu1  ;;  %3033 = vtanh.f32 %v1413_v44  ;;  %v1417_v10 = vadd.f32 %v1416_v5, %v3834_v48  ;;  %v1418_v11 = vpop.f32.mrb[131].mxu0  ;;  %1710 = vmatprep.mubr.bf16.mxu1 %v1171_v61 }
 0x1f4   : > { %3035 = vtanh.f32 %v1445_v6  ;;  %v1449_v12 = vadd.f32 %v1448_v9, %v3838_v50  ;;  %1711 = vmatmul.mubr.bf16.gmra.mrb[108].mxu1 %v1170_v58  ;;  %v1419_v59 = vadd.f32 %v1418_v11, %v3838_v50 }
 0x1f5   : > { %v3024_v57 = vpop.eup %3023  ;;  %3037 = vtanh.f32 %v1415_v63 }
 0x1f6   : > { %v3026_v62 = vpop.eup %3025  ;;  %3039 = vtanh.f32 %v1447_v2 }
 0x1f7   : > { %v3028_v14 = vpop.eup %3027  ;;  %3041 = vtanh.f32 %v1417_v10  ;;  %v1452_v15 = vpop.f32.mrb[4].mxu1 }
 0x1f8   : > { %v3030_v17 = vpop.eup %3029  ;;  %3043 = vtanh.f32 %v1449_v12  ;;  %v1453_v18 = vadd.f32 %v1452_v15, %v3834_v48  ;;  %v1422_v19 = vpop.f32.mrb[132].mxu0  ;;  %v1172_v21 = vpack.c.bf16 %v3028_v14, %v3024_v57 }
 0x1f9   : > { %v1454_v20 = vpop.f32.mrb[5].mxu1  ;;  %3045 = vtanh.f32 %v1419_v59  ;;  %v1423_v23 = vadd.f32 %v1422_v19, %v3834_v48  ;;  %v1424_v25 = vpop.f32.mrb[133].mxu0  ;;  %v1173_v28 = vpack.c.bf16 %v3030_v17, %v3026_v62 }
 0x1fa   : > { %v1455_v24 = vadd.f32 %v1454_v20, %v3838_v50  ;;  %v1456_v26 = vpop.f32.mrb[6].mxu1  ;;  %3047 = vtanh.f32 %v1453_v18  ;;  %v1425_v30 = vadd.f32 %v1424_v25, %v3838_v50  ;;  %v1426_v33 = vpop.f32.mrb[134].mxu0 }
 0x1fb   : > { %v1457_v31 = vadd.f32 %v1456_v26, %v3834_v48  ;;  %v1458_v34 = vpop.f32.mrb[7].mxu1  ;;  %3049 = vtanh.f32 %v1423_v23  ;;  %v1427_v35 = vadd.f32 %v1426_v33, %v3834_v48  ;;  %v1428_v36 = vpop.f32.mrb[135].mxu0  ;;  %1720 = vmatprep.mubr.bf16.mxu1 %v1173_v28 }
 0x1fc   : > { %v3032_v38 = vpop.eup %3031  ;;  %3051 = vtanh.f32 %v1455_v24  ;;  %v1459_v39 = vadd.f32 %v1458_v34, %v3838_v50  ;;  %1721 = vmatmul.mubr.bf16.gmra.mrb[112].mxu1 %v1172_v21  ;;  %v1429_v41 = vadd.f32 %v1428_v36, %v3838_v50 }
 0x1fd   : > { %v3034_v40 = vpop.eup %3033  ;;  %3053 = vtanh.f32 %v1425_v30  ;;  %v1892_v43 = vmul.f32 %v3032_v38, %v3855_v22 }
 0x1fe   : > { %v3036_v45 = vpop.eup %3035  ;;  %3055 = vtanh.f32 %v1457_v31  ;;  %v1880_v7 = vmul.f32 %v3034_v40, %v3855_v22 }
 0x1ff   : > { %v3038_v27 = vpop.eup %3037  ;;  %3057 = vtanh.f32 %v1427_v35  ;;  %v1462_v29 = vpop.f32.mrb[8].mxu1  ;;  %v1893_v32 = vmul.f32 %v3036_v45, %v3863_v37 }
 0x200   : > { %v3040_v3 = vpop.eup %3039  ;;  %3059 = vtanh.f32 %v1459_v39  ;;  %v1463_v46 = vadd.f32 %v1462_v29, %v3834_v48  ;;  %v1432_v49 = vpop.f32.mrb[136].mxu0  ;;  %v1881_v52 = vmul.f32 %v3038_v27, %v3863_v37 }
 0x201   : > { %v1464_v51 = vpop.f32.mrb[9].mxu1  ;;  %v3042_v53 = vpop.eup %3041  ;;  %3061 = vtanh.f32 %v1429_v41  ;;  %v1433_v54 = vadd.f32 %v1432_v49, %v3834_v48  ;;  %v2026_v58 = vadd.f32 %v1893_v32, %v1892_v43  ;;  %v1894_v61 = vmul.f32 %v3040_v3, %v3855_v22 }
 0x202   : > { %v1465_v8 = vadd.f32 %v1464_v51, %v3838_v50  ;;  %v1434_v55 = vpop.f32.mrb[137].mxu0  ;;  %v1466_v56 = vpop.f32.mrb[10].mxu1  ;;  %3063 = vtanh.f32 %v1463_v46  ;;  %v2008_v12 = vadd.f32 %v1881_v52, %v1880_v7  ;;  %v1882_v13 = vmul.f32 %v3042_v53, %v3855_v22 }
 0x203   : > { %v3044_v42 = vpop.eup %3043  ;;  %v1435_v44 = vadd.f32 %v1434_v55, %v3838_v50  ;;  %v1467_v6 = vadd.f32 %v1466_v56, %v3834_v48  ;;  %v1468_v47 = vpop.f32.mrb[11].mxu1  ;;  %3065 = vtanh.f32 %v1433_v54  ;;  %2027 = vadd.xlane.f32.xlu0 %v2026_v58 }
 0x204   : > { %v1436_v60 = vpop.f32.mrb[138].mxu0  ;;  %v3046_v63 = vpop.eup %3045  ;;  %v1469_v2 = vadd.f32 %v1468_v47, %v3838_v50  ;;  %v1895_v10 = vmul.f32 %v3044_v42, %v3863_v37  ;;  %3067 = vtanh.f32 %v1465_v8 }
 0x205   : > { %v1437_v5 = vadd.f32 %v1436_v60, %v3834_v48  ;;  %v1438_v9 = vpop.f32.mrb[139].mxu0  ;;  %v3048_v11 = vpop.eup %3047  ;;  %3069 = vtanh.f32 %v1435_v44  ;;  %v1883_v62 = vmul.f32 %v3046_v63, %v3863_v37 }
 0x206   : > { %v1439_v4 = vadd.f32 %v1438_v9, %v3838_v50  ;;  %v3050_v57 = vpop.eup %3049  ;;  %v2029_v59 = vadd.f32 %v1895_v10, %v1894_v61  ;;  %v1896_v14 = vmul.f32 %v3048_v11, %v3855_v22  ;;  %3071 = vtanh.f32 %v1467_v6 }
 0x207   : > { %v3052_v15 = vpop.eup %3051  ;;  %v1884_v16 = vmul.f32 %v3050_v57, %v3855_v22  ;;  %3073 = vtanh.f32 %v1469_v2  ;;  %2009 = vadd.xlane.f32.xlu0 %v2008_v12  ;;  %v1472_v18 = vpop.f32.mrb[12].mxu1  ;;  %v2011_v19 = vadd.f32 %v1883_v62, %v1882_v13 }
 0x208   : > { %v3054_v17 = vpop.eup %3053  ;;  %2030 = vadd.xlane.f32.xlu1 %v2029_v59  ;;  %v1897_v20 = vmul.f32 %v3052_v15, %v3863_v37  ;;  %3075 = vtanh.f32 %v1437_v5  ;;  %v1473_v23 = vadd.f32 %v1472_v18, %v3834_v48  ;;  %v1474_v24 = vpop.f32.mrb[13].mxu1 }
 0x209   : > { %v3056_v21 = vpop.eup %3055  ;;  %v1885_v25 = vmul.f32 %v3054_v17, %v3863_v37  ;;  %3077 = vtanh.f32 %v1439_v4  ;;  %v1475_v28 = vadd.f32 %v1474_v24, %v3838_v50  ;;  %v1476_v30 = vpop.f32.mrb[14].mxu1 }
 0x20a   : > { %v3058_v26 = vpop.eup %3057  ;;  %v2032_v31 = vadd.f32 %v1897_v20, %v1896_v14  ;;  %v1898_v33 = vmul.f32 %v3056_v21, %v3855_v22  ;;  %3079 = vtanh.f32 %v1473_v23  ;;  %v1477_v35 = vadd.f32 %v1476_v30, %v3834_v48  ;;  %v1478_v36 = vpop.f32.mrb[15].mxu1 }
 0x20b   : > { %v3060_v34 = vpop.eup %3059  ;;  %v2014_v38 = vadd.f32 %v1885_v25, %v1884_v16  ;;  %v1886_v39 = vmul.f32 %v3058_v26, %v3855_v22  ;;  %3081 = vtanh.f32 %v1475_v28  ;;  %v1479_v41 = vadd.f32 %v1478_v36, %v3838_v50  ;;  %2012 = vadd.xlane.f32.xlu0 %v2011_v19 }
 0x20c   : > { %v3062_v40 = vpop.eup %3061  ;;  %v1899_v43 = vmul.f32 %v3060_v34, %v3863_v37  ;;  %3083 = vtanh.f32 %v1477_v35 }
 0x20d   : > { %v3064_v45 = vpop.eup %3063  ;;  %2015 = vadd.xlane.f32.xlu1 %v2014_v38  ;;  %v1887_v27 = vmul.f32 %v3062_v40, %v3863_v37  ;;  %3085 = vtanh.f32 %v1479_v41 }
 0x20e   : > { %v3066_v29 = vpop.eup %3065  ;;  %v2035_v32 = vadd.f32 %v1899_v43, %v1898_v33  ;;  %v1900_v3 = vmul.f32 %v3064_v45, %v3855_v22 }
 0x20f   : > { %v3068_v46 = vpop.eup %3067  ;;  %v2017_v49 = vadd.f32 %v1887_v27, %v1886_v39  ;;  %v1888_v51 = vmul.f32 %v3066_v29, %v3855_v22  ;;  %2033 = vadd.xlane.f32.xlu0 %v2032_v31  ;;  %v1482_v52 = vpop.f32.mrb[16].mxu1 }
 0x210   : > { %v3070_v7 = vpop.eup %3069  ;;  %v1901_v53 = vmul.f32 %v3068_v46, %v3863_v37  ;;  %v1483_v8 = vadd.f32 %v1482_v52, %v3834_v48  ;;  %v1484_v55 = vpop.f32.mrb[17].mxu1 }
 0x211   : > { %v3072_v54 = vpop.eup %3071  ;;  %2036 = vadd.xlane.f32.xlu1 %v2035_v32  ;;  %v1889_v56 = vmul.f32 %v3070_v7, %v3863_v37  ;;  %v1485_v42 = vadd.f32 %v1484_v55, %v3838_v50  ;;  %v1486_v44 = vpop.f32.mrb[18].mxu1 }
 0x212   : > { %v3074_v58 = vpop.eup %3073  ;;  %v2038_v6 = vadd.f32 %v1901_v53, %v1900_v3  ;;  %v1902_v47 = vmul.f32 %v3072_v54, %v3855_v22  ;;  %3087 = vtanh.f32 %v1483_v8  ;;  %v1487_v61 = vadd.f32 %v1486_v44, %v3834_v48  ;;  %v1488_v63 = vpop.f32.mrb[19].mxu1 }
 0x213   : > { %v3076_v60 = vpop.eup %3075  ;;  %v2020_v2 = vadd.f32 %v1889_v56, %v1888_v51  ;;  %v1903_v5 = vmul.f32 %v3074_v58, %v3863_v37  ;;  %3089 = vtanh.f32 %v1485_v42  ;;  %v1489_v10 = vadd.f32 %v1488_v63, %v3838_v50 }
 0x214   : > { %v3078_v9 = vpop.eup %3077  ;;  %2039 = vadd.xlane.f32.xlu0 %v2038_v6  ;;  %v1890_v11 = vmul.f32 %v3076_v60, %v3855_v22  ;;  %3091 = vtanh.f32 %v1487_v61 }
 0x215   : > { %v3080_v4 = vpop.eup %3079  ;;  %2018 = vadd.xlane.f32.xlu1 %v2017_v49  ;;  %v2041_v12 = vadd.f32 %v1903_v5, %v1902_v47  ;;  %v1891_v13 = vmul.f32 %v3078_v9, %v3863_v37  ;;  %3093 = vtanh.f32 %v1489_v10 }
 0x216   : > { %v3082_v57 = vpop.eup %3081  ;;  %v1904_v59 = vmul.f32 %v3080_v4, %v3855_v22 }
 0x217   : > { %v3084_v62 = vpop.eup %3083  ;;  %v1905_v14 = vmul.f32 %v3082_v57, %v3863_v37  ;;  %v2023_v15 = vadd.f32 %v1891_v13, %v1890_v11  ;;  %v1492_v17 = vpop.f32.mrb[20].mxu1 }
 0x218   : > { %v3086_v16 = vpop.eup %3085  ;;  %2021 = vadd.xlane.f32.xlu0 %v2020_v2  ;;  %v1906_v18 = vmul.f32 %v3084_v62, %v3855_v22  ;;  %v1493_v19 = vadd.f32 %v1492_v17, %v3834_v48  ;;  %v1494_v20 = vpop.f32.mrb[21].mxu1 }
 0x219   : > { %2042 = vadd.xlane.f32.xlu1 %v2041_v12  ;;  %v2044_v21 = vadd.f32 %v1905_v14, %v1904_v59  ;;  %v1907_v23 = vmul.f32 %v3086_v16, %v3863_v37  ;;  %v1495_v24 = vadd.f32 %v1494_v20, %v3838_v50  ;;  %v1496_v25 = vpop.f32.mrb[22].mxu1 }
 0x21a   : > { %3095 = vtanh.f32 %v1493_v19  ;;  %v1497_v26 = vadd.f32 %v1496_v25, %v3834_v48  ;;  %v1498_v28 = vpop.f32.mrb[23].mxu1 }
 0x21b   : > { %v2047_v30 = vadd.f32 %v1907_v23, %v1906_v18  ;;  %3097 = vtanh.f32 %v1495_v24  ;;  %v1499_v31 = vadd.f32 %v1498_v28, %v3838_v50 }
 0x21c   : > { %2045 = vadd.xlane.f32.xlu0 %v2044_v21  ;;  %v3088_v33 = vpop.eup %3087  ;;  %3099 = vtanh.f32 %v1497_v26 }
 0x21d   : > { %2024 = vadd.xlane.f32.xlu1 %v2023_v15  ;;  %v3090_v34 = vpop.eup %3089  ;;  %3101 = vtanh.f32 %v1499_v31  ;;  %v1908_v35 = vmul.f32 %v3088_v33, %v3855_v22 }
 0x21e   : > { %v3092_v36 = vpop.eup %3091  ;;  %v1909_v38 = vmul.f32 %v3090_v34, %v3863_v37 }
 0x21f   : > { %v3094_v39 = vpop.eup %3093  ;;  %v1502_v40 = vpop.f32.mrb[24].mxu1  ;;  %v1910_v41 = vmul.f32 %v3092_v36, %v3855_v22 }
 0x220   : > { %v1503_v43 = vadd.f32 %v1502_v40, %v3834_v48  ;;  %v1504_v45 = vpop.f32.mrb[25].mxu1  ;;  %v2050_v27 = vadd.f32 %v1909_v38, %v1908_v35  ;;  %v1911_v29 = vmul.f32 %v3094_v39, %v3863_v37 }
 0x221   : > { %2048 = vadd.xlane.f32.xlu1 %v2047_v30  ;;  %v1505_v32 = vadd.f32 %v1504_v45, %v3838_v50  ;;  %v1506_v3 = vpop.f32.mrb[26].mxu1 }
 0x222   : > { %3103 = vtanh.f32 %v1503_v43  ;;  %v1507_v46 = vadd.f32 %v1506_v3, %v3834_v48  ;;  %v1508_v49 = vpop.f32.mrb[27].mxu1  ;;  %2051 = vadd.xlane.f32.xlu0 %v2050_v27  ;;  %v2053_v51 = vadd.f32 %v1911_v29, %v1910_v41 }
 0x223   : > { %3105 = vtanh.f32 %v1505_v32  ;;  %v1509_v7 = vadd.f32 %v1508_v49, %v3838_v50 }
 0x224   : > { %v3096_v52 = vpop.eup %3095  ;;  %3107 = vtanh.f32 %v1507_v46 }
 0x225   : > { %2054 = vadd.xlane.f32.xlu1 %v2053_v51  ;;  %v3098_v53 = vpop.eup %3097  ;;  %3109 = vtanh.f32 %v1509_v7  ;;  %v1912_v54 = vmul.f32 %v3096_v52, %v3855_v22 }
 0x226   : > { %v3100_v8 = vpop.eup %3099  ;;  %v1913_v55 = vmul.f32 %v3098_v53, %v3863_v37 }
 0x227   : > { %v3102_v56 = vpop.eup %3101  ;;  %v1512_v58 = vpop.f32.mrb[28].mxu1  ;;  %v1914_v42 = vmul.f32 %v3100_v8, %v3855_v22 }
 0x228   : > { %v1513_v44 = vadd.f32 %v1512_v58, %v3834_v48  ;;  %v1514_v6 = vpop.f32.mrb[29].mxu1  ;;  %v2056_v47 = vadd.f32 %v1913_v55, %v1912_v54  ;;  %v1915_v60 = vmul.f32 %v3102_v56, %v3863_v37 }
 0x229   : > { %v1515_v61 = vadd.f32 %v1514_v6, %v3838_v50  ;;  %v1516_v63 = vpop.f32.mrb[30].mxu1 }
 0x22a   : > { %3111 = vtanh.f32 %v1513_v44  ;;  %v1517_v2 = vadd.f32 %v1516_v63, %v3834_v48  ;;  %v1518_v5 = vpop.f32.mrb[31].mxu1  ;;  %2057 = vadd.xlane.f32.xlu0 %v2056_v47  ;;  %v2059_v9 = vadd.f32 %v1915_v60, %v1914_v42 }
 0x22b   : > { %3113 = vtanh.f32 %v1515_v61  ;;  %v1519_v10 = vadd.f32 %v1518_v5, %v3838_v50 }
 0x22c   : > { %v3104_v11 = vpop.eup %3103  ;;  %3115 = vtanh.f32 %v1517_v2  ;;  %2060 = vadd.xlane.f32.xlu1 %v2059_v9 }
 0x22d   : > { %v3106_v4 = vpop.eup %3105  ;;  %3117 = vtanh.f32 %v1519_v10  ;;  %v1916_v12 = vmul.f32 %v3104_v11, %v3855_v22 }
 0x22e   : > { %v3108_v13 = vpop.eup %3107  ;;  %v1917_v57 = vmul.f32 %v3106_v4, %v3863_v37 }
 0x22f   : > { %v3110_v59 = vpop.eup %3109  ;;  %v1522_v62 = vpop.f32.mrb[32].mxu1  ;;  %v1918_v14 = vmul.f32 %v3108_v13, %v3855_v22 }
 0x230   : > { %v1523_v15 = vadd.f32 %v1522_v62, %v3834_v48  ;;  %v1524_v16 = vpop.f32.mrb[33].mxu1  ;;  %v2062_v17 = vadd.f32 %v1917_v57, %v1916_v12  ;;  %v1919_v18 = vmul.f32 %v3110_v59, %v3863_v37 }
 0x231   : > { %v1525_v19 = vadd.f32 %v1524_v16, %v3838_v50  ;;  %v1526_v20 = vpop.f32.mrb[34].mxu1 }
 0x232   : > { %3119 = vtanh.f32 %v1523_v15  ;;  %v1527_v21 = vadd.f32 %v1526_v20, %v3834_v48  ;;  %v1528_v23 = vpop.f32.mrb[35].mxu1  ;;  %2063 = vadd.xlane.f32.xlu0 %v2062_v17  ;;  %v2065_v24 = vadd.f32 %v1919_v18, %v1918_v14 }
 0x233   : > { %3121 = vtanh.f32 %v1525_v19  ;;  %v1529_v25 = vadd.f32 %v1528_v23, %v3838_v50 }
 0x234   : > { %v3112_v26 = vpop.eup %3111  ;;  %3123 = vtanh.f32 %v1527_v21  ;;  %2066 = vadd.xlane.f32.xlu1 %v2065_v24 }
 0x235   : > { %v3114_v28 = vpop.eup %3113  ;;  %3125 = vtanh.f32 %v1529_v25  ;;  %v1920_v30 = vmul.f32 %v3112_v26, %v3855_v22 }
 0x236   : > { %v3116_v31 = vpop.eup %3115  ;;  %v1921_v33 = vmul.f32 %v3114_v28, %v3863_v37 }
 0x237   : > { %v3118_v34 = vpop.eup %3117  ;;  %v1532_v35 = vpop.f32.mrb[36].mxu1  ;;  %v1922_v36 = vmul.f32 %v3116_v31, %v3855_v22 }
 0x238   : > { %v1533_v38 = vadd.f32 %v1532_v35, %v3834_v48  ;;  %v1534_v39 = vpop.f32.mrb[37].mxu1  ;;  %v2068_v40 = vadd.f32 %v1921_v33, %v1920_v30  ;;  %v1923_v41 = vmul.f32 %v3118_v34, %v3863_v37 }
 0x239   : > { %v1535_v43 = vadd.f32 %v1534_v39, %v3838_v50  ;;  %v1536_v45 = vpop.f32.mrb[38].mxu1 }
 0x23a   : > { %3127 = vtanh.f32 %v1533_v38  ;;  %v1537_v27 = vadd.f32 %v1536_v45, %v3834_v48  ;;  %v1538_v29 = vpop.f32.mrb[39].mxu1  ;;  %2069 = vadd.xlane.f32.xlu0 %v2068_v40  ;;  %v2071_v32 = vadd.f32 %v1923_v41, %v1922_v36 }
 0x23b   : > { %3129 = vtanh.f32 %v1535_v43  ;;  %v1539_v3 = vadd.f32 %v1538_v29, %v3838_v50 }
 0x23c   : > { %v3120_v46 = vpop.eup %3119  ;;  %3131 = vtanh.f32 %v1537_v27  ;;  %2072 = vadd.xlane.f32.xlu1 %v2071_v32 }
 0x23d   : > { %v3122_v49 = vpop.eup %3121  ;;  %3133 = vtanh.f32 %v1539_v3  ;;  %v1924_v51 = vmul.f32 %v3120_v46, %v3855_v22 }
 0x23e   : > { %v3124_v7 = vpop.eup %3123  ;;  %v1925_v52 = vmul.f32 %v3122_v49, %v3863_v37 }
 0x23f   : > { %v3126_v53 = vpop.eup %3125  ;;  %v1542_v54 = vpop.f32.mrb[40].mxu1  ;;  %v1926_v8 = vmul.f32 %v3124_v7, %v3855_v22 }
 0x240   : > { %v1543_v55 = vadd.f32 %v1542_v54, %v3834_v48  ;;  %v1544_v56 = vpop.f32.mrb[41].mxu1  ;;  %v2074_v58 = vadd.f32 %v1925_v52, %v1924_v51  ;;  %v1927_v42 = vmul.f32 %v3126_v53, %v3863_v37 }
 0x241   : > { %v1545_v44 = vadd.f32 %v1544_v56, %v3838_v50  ;;  %v1546_v6 = vpop.f32.mrb[42].mxu1 }
 0x242   : > { %3135 = vtanh.f32 %v1543_v55  ;;  %v1547_v47 = vadd.f32 %v1546_v6, %v3834_v48  ;;  %v1548_v60 = vpop.f32.mrb[43].mxu1  ;;  %2075 = vadd.xlane.f32.xlu0 %v2074_v58  ;;  %v2077_v61 = vadd.f32 %v1927_v42, %v1926_v8 }
 0x243   : > { %3137 = vtanh.f32 %v1545_v44  ;;  %v1549_v63 = vadd.f32 %v1548_v60, %v3838_v50 }
 0x244   : > { %v3128_v2 = vpop.eup %3127  ;;  %3139 = vtanh.f32 %v1547_v47  ;;  %2078 = vadd.xlane.f32.xlu1 %v2077_v61 }
 0x245   : > { %v3130_v5 = vpop.eup %3129  ;;  %3141 = vtanh.f32 %v1549_v63  ;;  %v1928_v9 = vmul.f32 %v3128_v2, %v3855_v22 }
 0x246   : > { %v3132_v10 = vpop.eup %3131  ;;  %v1929_v11 = vmul.f32 %v3130_v5, %v3863_v37 }
 0x247   : > { %v3134_v4 = vpop.eup %3133  ;;  %v1552_v12 = vpop.f32.mrb[44].mxu1  ;;  %v1930_v13 = vmul.f32 %v3132_v10, %v3855_v22 }
 0x248   : > { %v1553_v57 = vadd.f32 %v1552_v12, %v3834_v48  ;;  %v1554_v59 = vpop.f32.mrb[45].mxu1  ;;  %v2080_v62 = vadd.f32 %v1929_v11, %v1928_v9  ;;  %v1931_v14 = vmul.f32 %v3134_v4, %v3863_v37 }
 0x249   : > { %v1555_v15 = vadd.f32 %v1554_v59, %v3838_v50  ;;  %v1556_v16 = vpop.f32.mrb[46].mxu1 }
 0x24a   : > { %3143 = vtanh.f32 %v1553_v57  ;;  %v1557_v17 = vadd.f32 %v1556_v16, %v3834_v48  ;;  %v1558_v18 = vpop.f32.mrb[47].mxu1  ;;  %2081 = vadd.xlane.f32.xlu0 %v2080_v62  ;;  %v2083_v19 = vadd.f32 %v1931_v14, %v1930_v13 }
 0x24b   : > { %3145 = vtanh.f32 %v1555_v15  ;;  %v1559_v20 = vadd.f32 %v1558_v18, %v3838_v50 }
 0x24c   : > { %v3136_v21 = vpop.eup %3135  ;;  %3147 = vtanh.f32 %v1557_v17  ;;  %2084 = vadd.xlane.f32.xlu1 %v2083_v19 }
 0x24d   : > { %v3138_v23 = vpop.eup %3137  ;;  %3149 = vtanh.f32 %v1559_v20  ;;  %v1932_v24 = vmul.f32 %v3136_v21, %v3855_v22 }
 0x24e   : > { %v3140_v25 = vpop.eup %3139  ;;  %v1933_v26 = vmul.f32 %v3138_v23, %v3863_v37 }
 0x24f   : > { %v3142_v28 = vpop.eup %3141  ;;  %v1562_v30 = vpop.f32.mrb[48].mxu1  ;;  %v1934_v31 = vmul.f32 %v3140_v25, %v3855_v22 }
 0x250   : > { %v1563_v33 = vadd.f32 %v1562_v30, %v3834_v48  ;;  %v1564_v34 = vpop.f32.mrb[49].mxu1  ;;  %v2086_v35 = vadd.f32 %v1933_v26, %v1932_v24  ;;  %v1935_v36 = vmul.f32 %v3142_v28, %v3863_v37 }
 0x251   : > { %v1565_v38 = vadd.f32 %v1564_v34, %v3838_v50  ;;  %v1566_v39 = vpop.f32.mrb[50].mxu1 }
 0x252   : > { %3151 = vtanh.f32 %v1563_v33  ;;  %v1567_v40 = vadd.f32 %v1566_v39, %v3834_v48  ;;  %v1568_v41 = vpop.f32.mrb[51].mxu1  ;;  %2087 = vadd.xlane.f32.xlu0 %v2086_v35  ;;  %v2089_v43 = vadd.f32 %v1935_v36, %v1934_v31 }
 0x253   : > { %3153 = vtanh.f32 %v1565_v38  ;;  %v1569_v45 = vadd.f32 %v1568_v41, %v3838_v50 }
 0x254   : > { %v3144_v27 = vpop.eup %3143  ;;  %3155 = vtanh.f32 %v1567_v40  ;;  %2090 = vadd.xlane.f32.xlu1 %v2089_v43 }
 0x255   : > { %v3146_v29 = vpop.eup %3145  ;;  %3157 = vtanh.f32 %v1569_v45  ;;  %v1936_v32 = vmul.f32 %v3144_v27, %v3855_v22 }
 0x256   : > { %v3148_v3 = vpop.eup %3147  ;;  %v1937_v46 = vmul.f32 %v3146_v29, %v3863_v37 }
 0x257   : > { %v3150_v49 = vpop.eup %3149  ;;  %v1572_v51 = vpop.f32.mrb[52].mxu1  ;;  %v1938_v7 = vmul.f32 %v3148_v3, %v3855_v22 }
 0x258   : > { %v1573_v52 = vadd.f32 %v1572_v51, %v3834_v48  ;;  %v1574_v53 = vpop.f32.mrb[53].mxu1  ;;  %v2092_v54 = vadd.f32 %v1937_v46, %v1936_v32  ;;  %v1939_v8 = vmul.f32 %v3150_v49, %v3863_v37 }
 0x259   : > { %v1575_v55 = vadd.f32 %v1574_v53, %v3838_v50  ;;  %v1576_v56 = vpop.f32.mrb[54].mxu1 }
 0x25a   : > { %3159 = vtanh.f32 %v1573_v52  ;;  %v1577_v58 = vadd.f32 %v1576_v56, %v3834_v48  ;;  %v1578_v42 = vpop.f32.mrb[55].mxu1  ;;  %2093 = vadd.xlane.f32.xlu0 %v2092_v54  ;;  %v2095_v44 = vadd.f32 %v1939_v8, %v1938_v7 }
 0x25b   : > { %3161 = vtanh.f32 %v1575_v55  ;;  %v1579_v6 = vadd.f32 %v1578_v42, %v3838_v50 }
 0x25c   : > { %v3152_v47 = vpop.eup %3151  ;;  %3163 = vtanh.f32 %v1577_v58  ;;  %2096 = vadd.xlane.f32.xlu1 %v2095_v44 }
 0x25d   : > { %v3154_v60 = vpop.eup %3153  ;;  %3165 = vtanh.f32 %v1579_v6  ;;  %v1940_v61 = vmul.f32 %v3152_v47, %v3855_v22 }
 0x25e   : > { %v3156_v63 = vpop.eup %3155  ;;  %v1941_v2 = vmul.f32 %v3154_v60, %v3863_v37 }
 0x25f   : > { %v3158_v5 = vpop.eup %3157  ;;  %v1582_v9 = vpop.f32.mrb[56].mxu1  ;;  %v1942_v10 = vmul.f32 %v3156_v63, %v3855_v22 }
 0x260   : > { %v1583_v11 = vadd.f32 %v1582_v9, %v3834_v48  ;;  %v1584_v4 = vpop.f32.mrb[57].mxu1  ;;  %v2098_v12 = vadd.f32 %v1941_v2, %v1940_v61  ;;  %v1943_v13 = vmul.f32 %v3158_v5, %v3863_v37 }
 0x261   : > { %v1585_v57 = vadd.f32 %v1584_v4, %v3838_v50  ;;  %v1586_v59 = vpop.f32.mrb[58].mxu1 }
 0x262   : > { %3167 = vtanh.f32 %v1583_v11  ;;  %v1587_v62 = vadd.f32 %v1586_v59, %v3834_v48  ;;  %v1588_v14 = vpop.f32.mrb[59].mxu1  ;;  %2099 = vadd.xlane.f32.xlu0 %v2098_v12  ;;  %v2101_v15 = vadd.f32 %v1943_v13, %v1942_v10 }
 0x263   : > { %3169 = vtanh.f32 %v1585_v57  ;;  %v1589_v16 = vadd.f32 %v1588_v14, %v3838_v50 }
 0x264   : > { %v3160_v17 = vpop.eup %3159  ;;  %3171 = vtanh.f32 %v1587_v62  ;;  %2102 = vadd.xlane.f32.xlu1 %v2101_v15 }
 0x265   : > { %v3162_v18 = vpop.eup %3161  ;;  %3173 = vtanh.f32 %v1589_v16  ;;  %v1944_v19 = vmul.f32 %v3160_v17, %v3855_v22 }
 0x266   : > { %v3164_v20 = vpop.eup %3163  ;;  %v1945_v21 = vmul.f32 %v3162_v18, %v3863_v37 }
 0x267   : > { %v3166_v23 = vpop.eup %3165  ;;  %v1592_v24 = vpop.f32.mrb[60].mxu1  ;;  %v1946_v25 = vmul.f32 %v3164_v20, %v3855_v22 }
 0x268   : > { %v1593_v26 = vadd.f32 %v1592_v24, %v3834_v48  ;;  %v1594_v28 = vpop.f32.mrb[61].mxu1  ;;  %v2104_v30 = vadd.f32 %v1945_v21, %v1944_v19  ;;  %v1947_v31 = vmul.f32 %v3166_v23, %v3863_v37 }
 0x269   : > { %v1595_v33 = vadd.f32 %v1594_v28, %v3838_v50  ;;  %v1596_v34 = vpop.f32.mrb[62].mxu1 }
 0x26a   : > { %3175 = vtanh.f32 %v1593_v26  ;;  %v1597_v35 = vadd.f32 %v1596_v34, %v3834_v48  ;;  %v1598_v36 = vpop.f32.mrb[63].mxu1  ;;  %2105 = vadd.xlane.f32.xlu0 %v2104_v30  ;;  %v2107_v38 = vadd.f32 %v1947_v31, %v1946_v25 }
 0x26b   : > { %3177 = vtanh.f32 %v1595_v33  ;;  %v1599_v39 = vadd.f32 %v1598_v36, %v3838_v50 }
 0x26c   : > { %v3168_v40 = vpop.eup %3167  ;;  %3179 = vtanh.f32 %v1597_v35  ;;  %2108 = vadd.xlane.f32.xlu1 %v2107_v38 }
 0x26d   : > { %v3170_v41 = vpop.eup %3169  ;;  %3181 = vtanh.f32 %v1599_v39  ;;  %v1948_v43 = vmul.f32 %v3168_v40, %v3855_v22 }
 0x26e   : > { %v3172_v45 = vpop.eup %3171  ;;  %v1949_v27 = vmul.f32 %v3170_v41, %v3863_v37 }
 0x26f   : > { %v3174_v29 = vpop.eup %3173  ;;  %v1602_v32 = vpop.f32.mrb[64].mxu1  ;;  %v1950_v3 = vmul.f32 %v3172_v45, %v3855_v22 }
 0x270   : > { %v1603_v46 = vadd.f32 %v1602_v32, %v3834_v48  ;;  %v1604_v49 = vpop.f32.mrb[65].mxu1  ;;  %v2110_v51 = vadd.f32 %v1949_v27, %v1948_v43  ;;  %v1951_v7 = vmul.f32 %v3174_v29, %v3863_v37 }
 0x271   : > { %v1605_v52 = vadd.f32 %v1604_v49, %v3838_v50  ;;  %v1606_v53 = vpop.f32.mrb[66].mxu1 }
 0x272   : > { %3183 = vtanh.f32 %v1603_v46  ;;  %v1607_v54 = vadd.f32 %v1606_v53, %v3834_v48  ;;  %v1608_v8 = vpop.f32.mrb[67].mxu1  ;;  %2111 = vadd.xlane.f32.xlu0 %v2110_v51  ;;  %v2113_v55 = vadd.f32 %v1951_v7, %v1950_v3 }
 0x273   : > { %3185 = vtanh.f32 %v1605_v52  ;;  %v1609_v56 = vadd.f32 %v1608_v8, %v3838_v50 }
 0x274   : > { %v3176_v58 = vpop.eup %3175  ;;  %3187 = vtanh.f32 %v1607_v54  ;;  %2114 = vadd.xlane.f32.xlu1 %v2113_v55 }
 0x275   : > { %v3178_v42 = vpop.eup %3177  ;;  %3189 = vtanh.f32 %v1609_v56  ;;  %v1952_v44 = vmul.f32 %v3176_v58, %v3855_v22 }
 0x276   : > { %v3180_v6 = vpop.eup %3179  ;;  %v1953_v47 = vmul.f32 %v3178_v42, %v3863_v37 }
 0x277   : > { %v3182_v60 = vpop.eup %3181  ;;  %v1612_v61 = vpop.f32.mrb[68].mxu1  ;;  %v1954_v63 = vmul.f32 %v3180_v6, %v3855_v22 }
 0x278   : > { %v1613_v2 = vadd.f32 %v1612_v61, %v3834_v48  ;;  %v1614_v5 = vpop.f32.mrb[69].mxu1  ;;  %v2116_v9 = vadd.f32 %v1953_v47, %v1952_v44  ;;  %v1955_v10 = vmul.f32 %v3182_v60, %v3863_v37 }
 0x279   : > { %v1615_v11 = vadd.f32 %v1614_v5, %v3838_v50  ;;  %v1616_v4 = vpop.f32.mrb[70].mxu1 }
 0x27a   : > { %3191 = vtanh.f32 %v1613_v2  ;;  %v1617_v12 = vadd.f32 %v1616_v4, %v3834_v48  ;;  %v1618_v13 = vpop.f32.mrb[71].mxu1  ;;  %2117 = vadd.xlane.f32.xlu0 %v2116_v9  ;;  %v2119_v57 = vadd.f32 %v1955_v10, %v1954_v63 }
 0x27b   : > { %3193 = vtanh.f32 %v1615_v11  ;;  %v1619_v59 = vadd.f32 %v1618_v13, %v3838_v50 }
 0x27c   : > { %v3184_v62 = vpop.eup %3183  ;;  %3195 = vtanh.f32 %v1617_v12  ;;  %2120 = vadd.xlane.f32.xlu1 %v2119_v57 }
 0x27d   : > { %v3186_v14 = vpop.eup %3185  ;;  %3197 = vtanh.f32 %v1619_v59  ;;  %v1956_v15 = vmul.f32 %v3184_v62, %v3855_v22 }
 0x27e   : > { %v3188_v16 = vpop.eup %3187  ;;  %v1957_v17 = vmul.f32 %v3186_v14, %v3863_v37 }
 0x27f   : > { %v3190_v18 = vpop.eup %3189  ;;  %v1622_v19 = vpop.f32.mrb[72].mxu1  ;;  %v1958_v20 = vmul.f32 %v3188_v16, %v3855_v22 }
 0x280   : > { %v1623_v21 = vadd.f32 %v1622_v19, %v3834_v48  ;;  %v1624_v23 = vpop.f32.mrb[73].mxu1  ;;  %v2122_v24 = vadd.f32 %v1957_v17, %v1956_v15  ;;  %v1959_v25 = vmul.f32 %v3190_v18, %v3863_v37 }
 0x281   : > { %v1625_v26 = vadd.f32 %v1624_v23, %v3838_v50  ;;  %v1626_v28 = vpop.f32.mrb[74].mxu1 }
 0x282   : > { %3199 = vtanh.f32 %v1623_v21  ;;  %v1627_v30 = vadd.f32 %v1626_v28, %v3834_v48  ;;  %v1628_v31 = vpop.f32.mrb[75].mxu1  ;;  %2123 = vadd.xlane.f32.xlu0 %v2122_v24  ;;  %v2125_v33 = vadd.f32 %v1959_v25, %v1958_v20 }
 0x283   : > { %3201 = vtanh.f32 %v1625_v26  ;;  %v1629_v34 = vadd.f32 %v1628_v31, %v3838_v50 }
 0x284   : > { %v3192_v35 = vpop.eup %3191  ;;  %3203 = vtanh.f32 %v1627_v30  ;;  %2126 = vadd.xlane.f32.xlu1 %v2125_v33 }
 0x285   : > { %v3194_v36 = vpop.eup %3193  ;;  %3205 = vtanh.f32 %v1629_v34  ;;  %v1960_v38 = vmul.f32 %v3192_v35, %v3855_v22 }
 0x286   : > { %v3196_v39 = vpop.eup %3195  ;;  %v1961_v40 = vmul.f32 %v3194_v36, %v3863_v37 }
 0x287   : > { %v3198_v41 = vpop.eup %3197  ;;  %v1632_v43 = vpop.f32.mrb[76].mxu1  ;;  %v1962_v45 = vmul.f32 %v3196_v39, %v3855_v22 }
 0x288   : > { %v1633_v27 = vadd.f32 %v1632_v43, %v3834_v48  ;;  %v1634_v29 = vpop.f32.mrb[77].mxu1  ;;  %v2128_v32 = vadd.f32 %v1961_v40, %v1960_v38  ;;  %v1963_v3 = vmul.f32 %v3198_v41, %v3863_v37 }
 0x289   : > { %v1635_v46 = vadd.f32 %v1634_v29, %v3838_v50  ;;  %v1636_v49 = vpop.f32.mrb[78].mxu1 }
 0x28a   : > { %3207 = vtanh.f32 %v1633_v27  ;;  %v1637_v51 = vadd.f32 %v1636_v49, %v3834_v48  ;;  %v1638_v7 = vpop.f32.mrb[79].mxu1  ;;  %2129 = vadd.xlane.f32.xlu0 %v2128_v32  ;;  %v2131_v52 = vadd.f32 %v1963_v3, %v1962_v45 }
 0x28b   : > { %3209 = vtanh.f32 %v1635_v46  ;;  %v1639_v53 = vadd.f32 %v1638_v7, %v3838_v50 }
 0x28c   : > { %v3200_v54 = vpop.eup %3199  ;;  %3211 = vtanh.f32 %v1637_v51  ;;  %2132 = vadd.xlane.f32.xlu1 %v2131_v52 }
 0x28d   : > { %v3202_v8 = vpop.eup %3201  ;;  %3213 = vtanh.f32 %v1639_v53  ;;  %v1964_v55 = vmul.f32 %v3200_v54, %v3855_v22 }
 0x28e   : > { %v3204_v56 = vpop.eup %3203  ;;  %v1965_v58 = vmul.f32 %v3202_v8, %v3863_v37 }
 0x28f   : > { %v3206_v42 = vpop.eup %3205  ;;  %v1642_v44 = vpop.f32.mrb[80].mxu1  ;;  %v1966_v6 = vmul.f32 %v3204_v56, %v3855_v22 }
 0x290   : > { %v1643_v47 = vadd.f32 %v1642_v44, %v3834_v48  ;;  %v1644_v60 = vpop.f32.mrb[81].mxu1  ;;  %v2134_v61 = vadd.f32 %v1965_v58, %v1964_v55  ;;  %v1967_v63 = vmul.f32 %v3206_v42, %v3863_v37 }
 0x291   : > { %v1645_v2 = vadd.f32 %v1644_v60, %v3838_v50  ;;  %v1646_v5 = vpop.f32.mrb[82].mxu1 }
 0x292   : > { %3215 = vtanh.f32 %v1643_v47  ;;  %v1647_v9 = vadd.f32 %v1646_v5, %v3834_v48  ;;  %v1648_v10 = vpop.f32.mrb[83].mxu1  ;;  %2135 = vadd.xlane.f32.xlu0 %v2134_v61  ;;  %v2137_v11 = vadd.f32 %v1967_v63, %v1966_v6 }
 0x293   : > { %3217 = vtanh.f32 %v1645_v2  ;;  %v1649_v4 = vadd.f32 %v1648_v10, %v3838_v50 }
 0x294   : > { %v3208_v12 = vpop.eup %3207  ;;  %3219 = vtanh.f32 %v1647_v9  ;;  %2138 = vadd.xlane.f32.xlu1 %v2137_v11 }
 0x295   : > { %v3210_v13 = vpop.eup %3209  ;;  %3221 = vtanh.f32 %v1649_v4  ;;  %v1968_v57 = vmul.f32 %v3208_v12, %v3855_v22 }
 0x296   : > { %v3212_v59 = vpop.eup %3211  ;;  %v1969_v62 = vmul.f32 %v3210_v13, %v3863_v37 }
 0x297   : > { %v3214_v14 = vpop.eup %3213  ;;  %v1652_v15 = vpop.f32.mrb[84].mxu1  ;;  %v1970_v16 = vmul.f32 %v3212_v59, %v3855_v22 }
 0x298   : > { %v1653_v17 = vadd.f32 %v1652_v15, %v3834_v48  ;;  %v1654_v18 = vpop.f32.mrb[85].mxu1  ;;  %v2140_v19 = vadd.f32 %v1969_v62, %v1968_v57  ;;  %v1971_v20 = vmul.f32 %v3214_v14, %v3863_v37 }
 0x299   : > { %v1655_v21 = vadd.f32 %v1654_v18, %v3838_v50  ;;  %v1656_v23 = vpop.f32.mrb[86].mxu1 }
 0x29a   : > { %3223 = vtanh.f32 %v1653_v17  ;;  %v1657_v24 = vadd.f32 %v1656_v23, %v3834_v48  ;;  %v1658_v25 = vpop.f32.mrb[87].mxu1  ;;  %2141 = vadd.xlane.f32.xlu0 %v2140_v19  ;;  %v2143_v26 = vadd.f32 %v1971_v20, %v1970_v16 }
 0x29b   : > { %3225 = vtanh.f32 %v1655_v21  ;;  %v1659_v28 = vadd.f32 %v1658_v25, %v3838_v50 }
 0x29c   : > { %v3216_v30 = vpop.eup %3215  ;;  %3227 = vtanh.f32 %v1657_v24  ;;  %2144 = vadd.xlane.f32.xlu1 %v2143_v26 }
 0x29d   : > { %v3218_v31 = vpop.eup %3217  ;;  %3229 = vtanh.f32 %v1659_v28  ;;  %v1972_v33 = vmul.f32 %v3216_v30, %v3855_v22 }
 0x29e   : > { %v3220_v34 = vpop.eup %3219  ;;  %v1973_v35 = vmul.f32 %v3218_v31, %v3863_v37 }
 0x29f   : > { %v3222_v36 = vpop.eup %3221  ;;  %v1662_v38 = vpop.f32.mrb[88].mxu1  ;;  %v1974_v39 = vmul.f32 %v3220_v34, %v3855_v22 }
 0x2a0   : > { %v1663_v40 = vadd.f32 %v1662_v38, %v3834_v48  ;;  %v1664_v41 = vpop.f32.mrb[89].mxu1  ;;  %v2146_v43 = vadd.f32 %v1973_v35, %v1972_v33  ;;  %v1975_v45 = vmul.f32 %v3222_v36, %v3863_v37 }
 0x2a1   : > { %v1665_v27 = vadd.f32 %v1664_v41, %v3838_v50  ;;  %v1666_v29 = vpop.f32.mrb[90].mxu1 }
 0x2a2   : > { %3231 = vtanh.f32 %v1663_v40  ;;  %v1667_v32 = vadd.f32 %v1666_v29, %v3834_v48  ;;  %v1668_v3 = vpop.f32.mrb[91].mxu1  ;;  %2147 = vadd.xlane.f32.xlu0 %v2146_v43  ;;  %v2149_v46 = vadd.f32 %v1975_v45, %v1974_v39 }
 0x2a3   : > { %3233 = vtanh.f32 %v1665_v27  ;;  %v1669_v49 = vadd.f32 %v1668_v3, %v3838_v50 }
 0x2a4   : > { %v3224_v51 = vpop.eup %3223  ;;  %3235 = vtanh.f32 %v1667_v32  ;;  %2150 = vadd.xlane.f32.xlu1 %v2149_v46 }
 0x2a5   : > { %v3226_v7 = vpop.eup %3225  ;;  %3237 = vtanh.f32 %v1669_v49  ;;  %v1976_v52 = vmul.f32 %v3224_v51, %v3855_v22 }
 0x2a6   : > { %v3228_v53 = vpop.eup %3227  ;;  %v1977_v54 = vmul.f32 %v3226_v7, %v3863_v37 }
 0x2a7   : > { %v3230_v8 = vpop.eup %3229  ;;  %v1672_v55 = vpop.f32.mrb[92].mxu1  ;;  %v1978_v56 = vmul.f32 %v3228_v53, %v3855_v22 }
 0x2a8   : > { %v1673_v58 = vadd.f32 %v1672_v55, %v3834_v48  ;;  %v1674_v42 = vpop.f32.mrb[93].mxu1  ;;  %v2152_v44 = vadd.f32 %v1977_v54, %v1976_v52  ;;  %v1979_v6 = vmul.f32 %v3230_v8, %v3863_v37 }
 0x2a9   : > { %v1675_v47 = vadd.f32 %v1674_v42, %v3838_v50  ;;  %v1676_v60 = vpop.f32.mrb[94].mxu1 }
 0x2aa   : > { %3239 = vtanh.f32 %v1673_v58  ;;  %v1677_v61 = vadd.f32 %v1676_v60, %v3834_v48  ;;  %v1678_v63 = vpop.f32.mrb[95].mxu1  ;;  %2153 = vadd.xlane.f32.xlu0 %v2152_v44  ;;  %v2155_v2 = vadd.f32 %v1979_v6, %v1978_v56 }
 0x2ab   : > { %3241 = vtanh.f32 %v1675_v47  ;;  %v1679_v5 = vadd.f32 %v1678_v63, %v3838_v50 }
 0x2ac   : > { %v3232_v9 = vpop.eup %3231  ;;  %3243 = vtanh.f32 %v1677_v61  ;;  %2156 = vadd.xlane.f32.xlu1 %v2155_v2 }
 0x2ad   : > { %v3234_v10 = vpop.eup %3233  ;;  %3245 = vtanh.f32 %v1679_v5  ;;  %v1980_v11 = vmul.f32 %v3232_v9, %v3855_v22 }
 0x2ae   : > { %v3236_v4 = vpop.eup %3235  ;;  %v1981_v12 = vmul.f32 %v3234_v10, %v3863_v37 }
 0x2af   : > { %v3238_v13 = vpop.eup %3237  ;;  %v1682_v57 = vpop.f32.mrb[96].mxu1  ;;  %v1982_v59 = vmul.f32 %v3236_v4, %v3855_v22 }
 0x2b0   : > { %v1683_v62 = vadd.f32 %v1682_v57, %v3834_v48  ;;  %v1684_v14 = vpop.f32.mrb[97].mxu1  ;;  %v2158_v15 = vadd.f32 %v1981_v12, %v1980_v11  ;;  %v1983_v16 = vmul.f32 %v3238_v13, %v3863_v37 }
 0x2b1   : > { %v1685_v17 = vadd.f32 %v1684_v14, %v3838_v50  ;;  %v1686_v18 = vpop.f32.mrb[98].mxu1 }
 0x2b2   : > { %3247 = vtanh.f32 %v1683_v62  ;;  %v1687_v19 = vadd.f32 %v1686_v18, %v3834_v48  ;;  %v1688_v20 = vpop.f32.mrb[99].mxu1  ;;  %2159 = vadd.xlane.f32.xlu0 %v2158_v15  ;;  %v2161_v21 = vadd.f32 %v1983_v16, %v1982_v59 }
 0x2b3   : > { %3249 = vtanh.f32 %v1685_v17  ;;  %v1689_v23 = vadd.f32 %v1688_v20, %v3838_v50 }
 0x2b4   : > { %v3240_v24 = vpop.eup %3239  ;;  %3251 = vtanh.f32 %v1687_v19  ;;  %2162 = vadd.xlane.f32.xlu1 %v2161_v21 }
 0x2b5   : > { %v3242_v25 = vpop.eup %3241  ;;  %3253 = vtanh.f32 %v1689_v23  ;;  %v1984_v26 = vmul.f32 %v3240_v24, %v3855_v22 }
 0x2b6   : > { %v3244_v28 = vpop.eup %3243  ;;  %v1985_v30 = vmul.f32 %v3242_v25, %v3863_v37 }
 0x2b7   : > { %v3246_v31 = vpop.eup %3245  ;;  %v1692_v33 = vpop.f32.mrb[100].mxu1  ;;  %v1986_v34 = vmul.f32 %v3244_v28, %v3855_v22 }
 0x2b8   : > { %v1693_v35 = vadd.f32 %v1692_v33, %v3834_v48  ;;  %v1694_v36 = vpop.f32.mrb[101].mxu1  ;;  %v2164_v38 = vadd.f32 %v1985_v30, %v1984_v26  ;;  %v1987_v39 = vmul.f32 %v3246_v31, %v3863_v37 }
 0x2b9   : > { %v1695_v40 = vadd.f32 %v1694_v36, %v3838_v50  ;;  %v1696_v41 = vpop.f32.mrb[102].mxu1 }
 0x2ba   : > { %3255 = vtanh.f32 %v1693_v35  ;;  %v1697_v43 = vadd.f32 %v1696_v41, %v3834_v48  ;;  %v1698_v45 = vpop.f32.mrb[103].mxu1  ;;  %2165 = vadd.xlane.f32.xlu0 %v2164_v38  ;;  %v2167_v27 = vadd.f32 %v1987_v39, %v1986_v34 }
 0x2bb   : > { %3257 = vtanh.f32 %v1695_v40  ;;  %v1699_v29 = vadd.f32 %v1698_v45, %v3838_v50 }
 0x2bc   : > { %v3248_v32 = vpop.eup %3247  ;;  %3259 = vtanh.f32 %v1697_v43  ;;  %2168 = vadd.xlane.f32.xlu1 %v2167_v27 }
 0x2bd   : > { %v3250_v3 = vpop.eup %3249  ;;  %3261 = vtanh.f32 %v1699_v29  ;;  %v1988_v46 = vmul.f32 %v3248_v32, %v3855_v22 }
 0x2be   : > { %v3252_v49 = vpop.eup %3251  ;;  %v1989_v51 = vmul.f32 %v3250_v3, %v3863_v37 }
 0x2bf   : > { %v3254_v7 = vpop.eup %3253  ;;  %v1990_v52 = vmul.f32 %v3252_v49, %v3855_v22  ;;  %v1702_v53 = vpop.f32.mrb[104].mxu1 }
 0x2c0   : > { %v2170_v54 = vadd.f32 %v1989_v51, %v1988_v46  ;;  %v1991_v8 = vmul.f32 %v3254_v7, %v3863_v37  ;;  %v1703_v55 = vadd.f32 %v1702_v53, %v3834_v48  ;;  %v1704_v56 = vpop.f32.mrb[105].mxu1 }
 0x2c1   : > { %v1705_v58 = vadd.f32 %v1704_v56, %v3838_v50  ;;  %v1706_v42 = vpop.f32.mrb[106].mxu1 }
 0x2c2   : > { %2171 = vadd.xlane.f32.xlu0 %v2170_v54  ;;  %v2173_v44 = vadd.f32 %v1991_v8, %v1990_v52  ;;  %3263 = vtanh.f32 %v1703_v55  ;;  %v1707_v6 = vadd.f32 %v1706_v42, %v3834_v48  ;;  %v1708_v47 = vpop.f32.mrb[107].mxu1 }
 0x2c3   : > { %3265 = vtanh.f32 %v1705_v58  ;;  %v1709_v60 = vadd.f32 %v1708_v47, %v3838_v50 }
 0x2c4   : > { %v3256_v61 = vpop.eup %3255  ;;  %2174 = vadd.xlane.f32.xlu1 %v2173_v44  ;;  %3267 = vtanh.f32 %v1707_v6  ;;  %v2028_v44 = vpop.xlane.xlu0 %2027 }
 0x2c5   : > { %v3258_v63 = vpop.eup %3257  ;;  %3269 = vtanh.f32 %v1709_v60  ;;  %v1992_v2 = vmul.f32 %v3256_v61, %v3855_v22  ;;  %v2031_v6 = vpop.xlane.xlu1 %2030 }
 0x2c6   : > { %v3260_v5 = vpop.eup %3259  ;;  %v1993_v9 = vmul.f32 %v3258_v63, %v3863_v37  ;;  %v4113_v63 = vld [vmem:[#allocation2] ss:$0 sm:$0xff] }
 0x2c7   : > { %v3262_v10 = vpop.eup %3261  ;;  %v1712_v11 = vpop.f32.mrb[108].mxu1  ;;  %v1994_v4 = vmul.f32 %v3260_v5, %v3855_v22 }
 0x2c8   : > { %v2176_v12 = vadd.f32 %v1993_v9, %v1992_v2  ;;  %v1713_v13 = vadd.f32 %v1712_v11, %v3834_v48  ;;  %v1714_v57 = vpop.f32.mrb[109].mxu1  ;;  %v1995_v59 = vmul.f32 %v3262_v10, %v3863_v37  ;;  %v2010_v47 = vpop.xlane.xlu0 %2009 }
 0x2c9   : > { %v1715_v62 = vadd.f32 %v1714_v57, %v3838_v50  ;;  %v1716_v14 = vpop.f32.mrb[110].mxu1  ;;  %v2016_v60 = vpop.xlane.xlu1 %2015  ;;  %v2207_v5 = vadd.f32 %v4113_v63, %v2010_v47 }
 0x2ca   : > { %2177 = vadd.xlane.f32.xlu0 %v2176_v12  ;;  %3271 = vtanh.f32 %v1713_v13  ;;  %v2179_v15 = vadd.f32 %v1995_v59, %v1994_v4  ;;  %v1717_v16 = vadd.f32 %v1716_v14, %v3834_v48  ;;  %v1718_v17 = vpop.f32.mrb[111].mxu1  ;;  %v2209_v11 = vadd.f32 %v4113_v63, %v2016_v60 }
 0x2cb   : > { %3273 = vtanh.f32 %v1715_v62  ;;  %v1719_v18 = vadd.f32 %v1718_v17, %v3838_v50 }
 0x2cc   : > { %v3264_v19 = vpop.eup %3263  ;;  %2180 = vadd.xlane.f32.xlu1 %v2179_v15  ;;  %3275 = vtanh.f32 %v1717_v16  ;;  %v2013_v61 = vpop.xlane.xlu0 %2012  ;;  %v2213_v16 = vadd.f32 %v4113_v63, %v2028_v44 }
 0x2cd   : > { %v3266_v20 = vpop.eup %3265  ;;  %3277 = vtanh.f32 %v1719_v18  ;;  %v1996_v21 = vmul.f32 %v3264_v19, %v3855_v22  ;;  %v2037_v2 = vpop.xlane.xlu1 %2036  ;;  %v2214_v18 = vadd.f32 %v4113_v63, %v2031_v6 }
 0x2ce   : > { %v3268_v23 = vpop.eup %3267  ;;  %v1997_v24 = vmul.f32 %v3266_v20, %v3863_v37 }
 0x2cf   : > { %v3270_v25 = vpop.eup %3269  ;;  %v1722_v26 = vpop.f32.mrb[112].mxu1  ;;  %v1998_v28 = vmul.f32 %v3268_v23, %v3855_v22 }
 0x2d0   : > { %v1723_v30 = vadd.f32 %v1722_v26, %v3834_v48  ;;  %v1724_v31 = vpop.f32.mrb[113].mxu1  ;;  %v1999_v33 = vmul.f32 %v3270_v25, %v3863_v37  ;;  %v4096_v34 = vadd.f32 %v1997_v24, %v1996_v21  ;;  %v2034_v9 = vpop.xlane.xlu0 %2033  ;;  %v2216_v26 = vadd.f32 %v4113_v63, %v2037_v2 }
 0x2d1   : > { %v1725_v35 = vadd.f32 %v1724_v31, %v3838_v50  ;;  %v1726_v36 = vpop.f32.mrb[114].mxu1  ;;  %v2019_v10 = vpop.xlane.xlu1 %2018  ;;  %v2215_v21 = vadd.f32 %v4113_v63, %v2034_v9 }
 0x2d2   : > { %3279 = vtanh.f32 %v1723_v30  ;;  %v1727_v38 = vadd.f32 %v1726_v36, %v3834_v48  ;;  %v1728_v39 = vpop.f32.mrb[115].mxu1  ;;  %v2185_v40 = vadd.f32 %v1999_v33, %v1998_v28  ;;  %v2210_v12 = vadd.f32 %v4113_v63, %v2019_v10 }
 0x2d3   : > { %3281 = vtanh.f32 %v1725_v35  ;;  %v1729_v41 = vadd.f32 %v1728_v39, %v3838_v50 }
 0x2d4   : > { %v3272_v43 = vpop.eup %3271  ;;  %3283 = vtanh.f32 %v1727_v38  ;;  %2186 = vadd.xlane.f32.xlu1 %v2185_v40 }
 0x2d5   : > { %v3274_v45 = vpop.eup %3273  ;;  %3285 = vtanh.f32 %v1729_v41  ;;  %v2000_v27 = vmul.f32 %v3272_v43, %v3855_v22  ;;  %v2043_v4 = vpop.xlane.xlu1 %2042 }
 0x2d6   : > { %v3276_v29 = vpop.eup %3275  ;;  %v2001_v32 = vmul.f32 %v3274_v45, %v3863_v37  ;;  %v2218_v39 = vadd.f32 %v4113_v63, %v2043_v4 }
 0x2d7   : > { %v3278_v3 = vpop.eup %3277  ;;  %v2002_v46 = vmul.f32 %v3276_v29, %v3855_v22 }
 0x2d8   : > { %v2003_v48 = vmul.f32 %v3278_v3, %v3863_v37  ;;  %v4105_v49 = vadd.f32 %v2001_v32, %v2000_v27 }
 0x2d9   : > { %v2025_v59 = vpop.xlane.xlu1 %2024 }
 0x2da   : > { %v2191_v51 = vadd.f32 %v2003_v48, %v2002_v46  ;;  %v2212_v62 = vadd.f32 %v4113_v63, %v2025_v59 }
 0x2dc   : > { %v3280_v7 = vpop.eup %3279  ;;  %2192 = vadd.xlane.f32.xlu1 %v2191_v51 }
 0x2dd   : > { %v3282_v50 = vpop.eup %3281  ;;  %v2004_v52 = vmul.f32 %v3280_v7, %v3855_v22  ;;  %v2049_v15 = vpop.xlane.xlu1 %2048 }
 0x2de   : > { %v3284_v53 = vpop.eup %3283  ;;  %v2005_v54 = vmul.f32 %v3282_v50, %v3863_v37  ;;  %v2220_v3 = vadd.f32 %v4113_v63, %v2049_v15 }
 0x2df   : > { %v3286_v8 = vpop.eup %3285  ;;  %v2006_v55 = vmul.f32 %v3284_v53, %v3855_v22  ;;  %v2208_v22 = vadd.f32 %v4113_v63, %v2013_v61 }
 0x2e0   : > { %v2007_v56 = vmul.f32 %v3286_v8, %v3863_v37  ;;  %v4111_v58 = vadd.f32 %v2005_v54, %v2004_v52  ;;  %v2040_v37 = vpop.xlane.xlu0 %2039 }
 0x2e1   : > { %v2055_v19 = vpop.xlane.xlu1 %2054  ;;  %v2217_v33 = vadd.f32 %v4113_v63, %v2040_v37 }
 0x2e2   : > { %v2197_v42 = vadd.f32 %v2007_v56, %v2006_v55  ;;  %v2222_v54 = vadd.f32 %v4113_v63, %v2055_v19 }
 0x2e4   : > { %2198 = vadd.xlane.f32.xlu1 %v2197_v42  ;;  %v2022_v13 = vpop.xlane.xlu0 %2021 }
 0x2e5   : > { %v2211_v57 = vadd.f32 %v4113_v63, %v2022_v13  ;;  %v2061_v24 = vpop.xlane.xlu1 %2060 }
 0x2e6   : > { %v2224_v28 = vadd.f32 %v4113_v63, %v2061_v24 }
 0x2e8   : > { %v2046_v14 = vpop.xlane.xlu0 %2045 }
 0x2e9   : > { %v2067_v30 = vpop.xlane.xlu1 %2066  ;;  %v2219_v45 = vadd.f32 %v4113_v63, %v2046_v14 }
 0x2ea   : > { %v2226_v40 = vadd.f32 %v4113_v63, %v2067_v30 }
 0x2ec   : > { %v2052_v17 = vpop.xlane.xlu0 %2051 }
 0x2ed   : > { %v2073_v36 = vpop.xlane.xlu1 %2072  ;;  %v2221_v7 = vadd.f32 %v4113_v63, %v2052_v17 }
 0x2ee   : > { %v2228_v46 = vadd.f32 %v4113_v63, %v2073_v36 }
 0x2f0   : > { %v2058_v20 = vpop.xlane.xlu0 %2057 }
 0x2f1   : > { %v2223_v23 = vadd.f32 %v4113_v63, %v2058_v20  ;;  %v2079_v41 = vpop.xlane.xlu1 %2078 }
 0x2f2   : > { %v2230_v8 = vadd.f32 %v4113_v63, %v2079_v41 }
 0x2f4   : > { %v2064_v25 = vpop.xlane.xlu0 %2063 }
 0x2f5   : > { %v2225_v35 = vadd.f32 %v4113_v63, %v2064_v25  ;;  %v2085_v29 = vpop.xlane.xlu1 %2084 }
 0x2f6   : > { %v2232_v47 = vadd.f32 %v4113_v63, %v2085_v29 }
 0x2f7   : > { %2271 = vxpose.xlu0.b32.start [1/16] (narrow) %v2207_v5, 8 }
 0x2f8   : > { %v2070_v31 = vpop.xlane.xlu0 %2069 }
 0x2f9   : > { %v2227_v27 = vadd.f32 %v4113_v63, %v2070_v31  ;;  %v2091_v48 = vpop.xlane.xlu1 %2090 }
 0x2fb   : > { %2272 = vxpose.xlu0.b32.cont [2/16] (narrow) %v2208_v22, 8  ;;  %v2234_v22 = vadd.f32 %v4113_v63, %v2091_v48 }
 0x2fc   : > { %v2076_v38 = vpop.xlane.xlu0 %2075 }
 0x2fd   : > { %v2229_v50 = vadd.f32 %v4113_v63, %v2076_v38  ;;  %v2097_v52 = vpop.xlane.xlu1 %2096 }
 0x2fe   : > { %v2236_v13 = vadd.f32 %v4113_v63, %v2097_v52 }
 0x2ff   : > { %2273 = vxpose.xlu0.b32.cont [3/16] (narrow) %v2209_v11, 8 }
 0x300   : > { %v2082_v43 = vpop.xlane.xlu0 %2081 }
 0x301   : > { %v2103_v55 = vpop.xlane.xlu1 %2102  ;;  %v2231_v42 = vadd.f32 %v4113_v63, %v2082_v43 }
 0x303   : > { %2274 = vxpose.xlu0.b32.cont [4/16] (narrow) %v2210_v12, 8 }
 0x304   : > { %v2088_v32 = vpop.xlane.xlu0 %2087 }
 0x305   : > { %v4142_v44 = vpop.xlane.xlu1 %2108  ;;  %v2233_v2 = vadd.f32 %v4113_v63, %v2088_v32 }
 0x306   : > { %v2240_v43 = vadd.f32 %v4113_v63, %v4142_v44 }
 0x307   : > { %2275 = vxpose.xlu0.b32.cont [5/16] (narrow) %v2211_v57, 8 }
 0x308   : > { %v2094_v51 = vpop.xlane.xlu0 %2093 }
 0x309   : > { %v4147_v60 = vpop.xlane.xlu1 %2114  ;;  %v2235_v11 = vadd.f32 %v4113_v63, %v2094_v51 }
 0x30b   : > { %2276 = vxpose.xlu0.b32.cont [6/16] (narrow) %v2212_v62, 8 }
 0x30c   : > { %v2100_v53 = vpop.xlane.xlu0 %2099 }
 0x30d   : > { %v4152_v5 = vpop.xlane.xlu1 %2120  ;;  %v2237_v62 = vadd.f32 %v4113_v63, %v2100_v53 }
 0x30e   : > { %v2244_v32 = vadd.f32 %v4113_v63, %v4152_v5 }
 0x30f   : > { %2277 = vxpose.xlu0.b32.cont [7/16] (narrow) %v2213_v16, 8  ;;  %v2238_v16 = vadd.f32 %v4113_v63, %v2103_v55 }
 0x310   : > { %v4139_v56 = vpop.xlane.xlu0 %2105 }
 0x311   : > { %v4157_v10 = vpop.xlane.xlu1 %2126 }
 0x313   : > { %2278 = vxpose.xlu0.b32.cont [8/16] (narrow) %v2214_v18, 8 }
 0x314   : > { %v4144_v6 = vpop.xlane.xlu0 %2111 }
 0x317   : > { %2279 = vxpose.xlu0.b32.cont [9/16] (narrow) %v2215_v21, 8  ;;  %2303 = vxpose.xlu1.b32.start [1/16] (narrow) %v2223_v23, 8 }
 0x318   : > { %v4149_v61 = vpop.xlane.xlu0 %2117 }
 0x319   : > { %v4162_v4 = vpop.xlane.xlu1 %2132  ;;  %v2243_v29 = vadd.f32 %v4113_v63, %v4149_v61 }
 0x31a   : > { %v2248_v51 = vadd.f32 %v4113_v63, %v4162_v4 }
 0x31b   : > { %2280 = vxpose.xlu0.b32.cont [10/16] (narrow) %v2216_v26, 8  ;;  %2304 = vxpose.xlu1.b32.cont [2/16] (narrow) %v2224_v28, 8 }
 0x31c   : > { %v4154_v9 = vpop.xlane.xlu0 %2123 }
 0x31f   : > { %2281 = vxpose.xlu0.b32.cont [11/16] (narrow) %v2217_v33, 8  ;;  %2305 = vxpose.xlu1.b32.cont [3/16] (narrow) %v2225_v35, 8 }
 0x320   : > { %v4159_v37 = vpop.xlane.xlu0 %2129 }
 0x321   : > { %v4167_v57 = vpop.xlane.xlu1 %2138  ;;  %v2247_v48 = vadd.f32 %v4113_v63, %v4159_v37  ;;  %v3352_v37 = vmov 1966171168  }
 0x323   : > { %2282 = vxpose.xlu0.b32.cont [12/16] (narrow) %v2218_v39, 8  ;;  %2306 = vxpose.xlu1.b32.cont [4/16] (narrow) %v2226_v40, 8 }
 0x324   : > { %v4164_v12 = vpop.xlane.xlu0 %2135 }
 0x327   : > { %2283 = vxpose.xlu0.b32.cont [13/16] (narrow) %v2219_v45, 8  ;;  %2307 = vxpose.xlu1.b32.cont [5/16] (narrow) %v2227_v27, 8  ;;  %v2241_v45 = vadd.f32 %v4113_v63, %v4144_v6  ;;  %v2242_v27 = vadd.f32 %v4113_v63, %v4147_v60 }
 0x328   : > { %v4169_v59 = vpop.xlane.xlu0 %2141 }
 0x329   : > { %v4172_v14 = vpop.xlane.xlu1 %2144  ;;  %v2251_v52 = vadd.f32 %v4113_v63, %v4169_v59 }
 0x32a   : > { %v2252_v53 = vadd.f32 %v4113_v63, %v4172_v14 }
 0x32b   : > { %2284 = vxpose.xlu0.b32.cont [14/16] (narrow) %v2220_v3, 8  ;;  %2308 = vxpose.xlu1.b32.cont [6/16] (narrow) %v2228_v46, 8  ;;  %v2245_v3 = vadd.f32 %v4113_v63, %v4154_v9  ;;  %v2246_v46 = vadd.f32 %v4113_v63, %v4157_v10 }
 0x32f   : > { %2285 = vxpose.xlu0.b32.cont [15/16] (narrow) %v2221_v7, 8  ;;  %2309 = vxpose.xlu1.b32.cont [7/16] (narrow) %v2229_v50, 8  ;;  %v4174_v15 = vpop.xlane.xlu0 %2147  ;;  %v2249_v7 = vadd.f32 %v4113_v63, %v4164_v12  ;;  %v2250_v50 = vadd.f32 %v4113_v63, %v4167_v57 }
 0x331   : > { %v4177_v17 = vpop.xlane.xlu1 %2150 }
 0x333   : > { %2286 = vxpose.xlu0.b32.end [16/16] (narrow) %v2222_v54, 8  ;;  %2310 = vxpose.xlu1.b32.cont [8/16] (narrow) %v2230_v8, 8  ;;  %v2253_v54 = vadd.f32 %v4113_v63, %v4174_v15  ;;  %v2254_v8 = vadd.f32 %v4113_v63, %v4177_v17 }
 0x337   : > { %2311 = vxpose.xlu1.b32.cont [9/16] (narrow) %v2231_v42, 8  ;;  %v2154_v18 = vpop.xlane.xlu0 %2153 }
 0x338   : > { %v2255_v19 = vadd.f32 %v4113_v63, %v2154_v18 }
 0x339   : > { %v2157_v20 = vpop.xlane.xlu1 %2156 }
 0x33a   : > { %v2256_v21 = vadd.f32 %v4113_v63, %v2157_v20 }
 0x33b   : > { %2312 = vxpose.xlu1.b32.cont [10/16] (narrow) %v2232_v47, 8 }
 0x33f   : > { %2313 = vxpose.xlu1.b32.cont [11/16] (narrow) %v2233_v2, 8  ;;  %v2160_v23 = vpop.xlane.xlu0 %2159 }
 0x340   : > { %v2257_v24 = vadd.f32 %v4113_v63, %v2160_v23 }
 0x341   : > { %v2163_v25 = vpop.xlane.xlu1 %2162 }
 0x342   : > { %v2258_v26 = vadd.f32 %v4113_v63, %v2163_v25 }
 0x343   : > { %2314 = vxpose.xlu1.b32.cont [12/16] (narrow) %v2234_v22, 8 }
 0x347   : > { %2315 = vxpose.xlu1.b32.cont [13/16] (narrow) %v2235_v11, 8  ;;  %v2166_v28 = vpop.xlane.xlu0 %2165  ;;  %v2406_v11 = vunpack.c.l.s4 %v3352_v37 }
 0x348   : > { %v2259_v30 = vadd.f32 %v4113_v63, %v2166_v28 }
 0x349   : > { %v2169_v31 = vpop.xlane.xlu1 %2168  ;;  %v2407_v4 = vunpack.c.0.s8 %v2406_v11 }
 0x34a   : > { %v2260_v33 = vadd.f32 %v4113_v63, %v2169_v31 }
 0x34b   : > { %2316 = vxpose.xlu1.b32.cont [14/16] (narrow) %v2236_v13, 8  ;;  %v2410_v57 = vsub.s32 %v2407_v4, %v3629_v1 }
 0x34f   : > { %2317 = vxpose.xlu1.b32.cont [15/16] (narrow) %v2237_v62, 8  ;;  %v2172_v35 = vpop.xlane.xlu0 %2171 }
 0x350   : > { %v2261_v36 = vadd.f32 %v4113_v63, %v2172_v35 }
 0x351   : > { %v2175_v38 = vpop.xlane.xlu1 %2174 }
 0x353   : > { %2318 = vxpose.xlu1.b32.end [16/16] (narrow) %v2238_v16, 8 }
 0x357   : > { %2367 = vxpose.xlu1.b32.start [1/16] (narrow) %v2255_v19, 8  ;;  %v2178_v39 = vpop.xlane.xlu0 %2177 }
 0x359   : > { %v2181_v40 = vpop.xlane.xlu1 %2180 }
 0x35a   : > { %v2264_v41 = vadd.f32 %v4113_v63, %v2181_v40 }
 0x35b   : > { %2368 = vxpose.xlu1.b32.cont [2/16] (narrow) %v2256_v21, 8 }
 0x35f   : > { %2369 = vxpose.xlu1.b32.cont [3/16] (narrow) %v2257_v24, 8 }
 0x360   : > { %2183 = vadd.xlane.f32.xlu0 %v4096_v34  ;;  %v2262_v34 = vadd.f32 %v4113_v63, %v2175_v38 }
 0x361   : > { %v2187_v44 = vpop.xlane.xlu1 %2186 }
 0x362   : > { %v2266_v6 = vadd.f32 %v4113_v63, %v2187_v44 }
 0x363   : > { %2370 = vxpose.xlu1.b32.cont [4/16] (narrow) %v2258_v26, 8 }
 0x364   : > { %2189 = vadd.xlane.f32.xlu0 %v4105_v49  ;;  %v2263_v49 = vadd.f32 %v4113_v63, %v2178_v39 }
 0x367   : > { %2371 = vxpose.xlu1.b32.cont [5/16] (narrow) %v2259_v30, 8 }
 0x368   : > { %2195 = vadd.xlane.f32.xlu0 %v4111_v58  ;;  %v2239_v58 = vadd.f32 %v4113_v63, %v4139_v56 }
 0x369   : > { %v2193_v61 = vpop.xlane.xlu1 %2192 }
 0x36a   : > { %v2268_v2 = vadd.f32 %v4113_v63, %v2193_v61 }
 0x36b   : > { %2372 = vxpose.xlu1.b32.cont [6/16] (narrow) %v2260_v33, 8 }
 0x36f   : > { %2373 = vxpose.xlu1.b32.cont [7/16] (narrow) %v2261_v36, 8 }
 0x371   : > { %v2199_v22 = vpop.xlane.xlu1 %2198 }
 0x372   : > { %v2270_v10 = vadd.f32 %v4113_v63, %v2199_v22 }
 0x373   : > { %2374 = vxpose.xlu1.b32.cont [8/16] (narrow) %v2262_v34, 8 }
 0x377   : > { %2375 = vxpose.xlu1.b32.cont [9/16] (narrow) %v2263_v49, 8  ;;  %v2287_v55 = vpop.trf.xlu0 }
 0x37b   : > { %2376 = vxpose.xlu1.b32.cont [10/16] (narrow) %v2264_v41, 8 }
 0x395   : > { %2335 = vxpose.xlu0.b32.start [1/16] (narrow) %v2239_v58, 8 }
 0x397   : > { %v2319_v12 = vpop.trf.xlu1 }
 0x398   : > { %v2403_v59 = vcombine.low %v2287_v55, %v2319_v12 }
 0x399   : > { %2336 = vxpose.xlu0.b32.cont [2/16] (narrow) %v2240_v43, 8 }
 0x39a   : > { %v2411_v15 = vrot.slane %v2403_v59, %v2410_v57 }
 0x39d   : > { %2337 = vxpose.xlu0.b32.cont [3/16] (narrow) %v2241_v45, 8 }
 0x3a1   : > { %2338 = vxpose.xlu0.b32.cont [4/16] (narrow) %v2242_v27, 8 }
 0x3a5   : > { %2339 = vxpose.xlu0.b32.cont [5/16] (narrow) %v2243_v29, 8 }
 0x3a9   : > { %2340 = vxpose.xlu0.b32.cont [6/16] (narrow) %v2244_v32, 8 }
 0x3ad   : > { %2341 = vxpose.xlu0.b32.cont [7/16] (narrow) %v2245_v3, 8 }
 0x3b1   : > { %2342 = vxpose.xlu0.b32.cont [8/16] (narrow) %v2246_v46, 8 }
 0x3b5   : > { %2343 = vxpose.xlu0.b32.cont [9/16] (narrow) %v2247_v48, 8 }
 0x3b9   : > { %2344 = vxpose.xlu0.b32.cont [10/16] (narrow) %v2248_v51, 8 }
 0x3bd   : > { %2345 = vxpose.xlu0.b32.cont [11/16] (narrow) %v2249_v7, 8 }
 0x3c1   : > { %2346 = vxpose.xlu0.b32.cont [12/16] (narrow) %v2250_v50, 8 }
 0x3c5   : > { %2347 = vxpose.xlu0.b32.cont [13/16] (narrow) %v2251_v52, 8 }
 0x3c9   : > { %2348 = vxpose.xlu0.b32.cont [14/16] (narrow) %v2252_v53, 8 }
 0x3cd   : > { %2349 = vxpose.xlu0.b32.cont [15/16] (narrow) %v2253_v54, 8 }
 0x3d1   : > { %2350 = vxpose.xlu0.b32.end [16/16] (narrow) %v2254_v8, 8 }
 0x3ed   : > { %v2184_v56 = vpop.xlane.xlu0 %2183 }
 0x3ee   : > { %v2265_v42 = vadd.f32 %v4113_v63, %v2184_v56 }
 0x3f0   : > { %2377 = vxpose.xlu1.b32.cont [11/16] (narrow) %v2265_v42, 8 }
 0x3f1   : > { %v2190_v47 = vpop.xlane.xlu0 %2189 }
 0x3f2   : > { %v2267_v60 = vadd.f32 %v4113_v63, %v2190_v47 }
 0x3f4   : > { %2378 = vxpose.xlu1.b32.cont [12/16] (narrow) %v2266_v6, 8 }
 0x3f5   : > { %v2196_v5 = vpop.xlane.xlu0 %2195 }
 0x3f6   : > { %v2269_v9 = vadd.f32 %v4113_v63, %v2196_v5 }
 0x3f8   : > { %2379 = vxpose.xlu1.b32.cont [13/16] (narrow) %v2267_v60, 8 }
 0x3fc   : > { %2380 = vxpose.xlu1.b32.cont [14/16] (narrow) %v2268_v2, 8 }
 0x400   : > { %2381 = vxpose.xlu1.b32.cont [15/16] (narrow) %v2269_v9, 8 }
 0x404   : > { %2382 = vxpose.xlu1.b32.end [16/16] (narrow) %v2270_v10, 8 }
 0x415   : > { %v2351_v13 = vpop.trf.xlu0 }
 0x448   : > { %v2383_v62 = vpop.trf.xlu1 }
 0x449   : > { %v2404_v14 = vcombine.low %v2351_v13, %v2383_v62 }
 0x44b   : > { %v2418_v16 = vrot.slane %v2404_v14, %v2410_v57 }
 0x44d   : > { %v2419_v63 = vcombine.low %v2411_v15, %v2418_v16 }
 0x44f   : > { %v2426_v17 = vrot.slane %v2419_v63, %v2410_v57 }
 0x451   : > { %2432 = vst.msk [vmem:[%s274_s22] sm:$0xf] %vm2430_vm2, %v2426_v17 }
 0x452   : > { %3300 = shalt.err (!%p3297_p3)
}
 0x453   : > { %s3301_s16 = scalar_lea.hbm %s4237_s6, 64  ;;  %s3305_s19 = scalar_lea.hbm %s4286_s7, 128 }
 0x454   : > { %p3302_p4 = scmp.ne.s32.totalorder %s4237_s6, %s3301_s16  ;;  %p3306_p9 = scmp.lt.u32.totalorder %s4237_s6, %s4286_s7 }
 0x455   : > { %p3307_p10 = scmp.lt.u32.totalorder %s3305_s19, %s3301_s16  ;;  %p3309_p12 = scmp.lt.u32.totalorder %s3301_s16, %s4237_s6 }
 0x456   : > { %p3303_p7 = pnand %p3302_p4, %p3432_p5 }
 0x457   : > { %p3308_p11 = por %p3307_p10, %p3306_p9 }
 0x458   : > { %p3304_p8 = pneg %p3303_p7 }
 0x459   : > { %p3310_p13 = por %p3309_p12, %p3308_p11 }
 0x45b   : > { %p3311_p0 = pnand %p3310_p13, %p3304_p8 }
 0x45d   : > { %3314 = shalt.err (!%p3311_p0)
}
 0x45e   : > { %2652 = dma.vmem_to_hbm [thread:$0]  (%p3432_p5), %s4239_s23, 64, %s4237_s6, %s2434_s30  }
 0x45f PF: > { %p2658_p1 = scmp.ge.s32.totalorder %s3349_s29, 2  ;;  %s2460_s22 = sand.u32 1, %s3337_s26  }
 0x460   : > { %s2461_s24 = scalar_lea.sflag [#allocation4], %s2460_s22 }
 0x461   : > { %p2655_p2 = pnand %p2658_p1, %p3436_p6 }
 0x463   : > { %3332 = dma.done.wait (!%p2655_p2), %s2461_s24, 64  }
 0x464   : > { %3334 = vsyncadd (!%p2655_p2), %s2461_s24, 4294967232  ;;  %p19_p3 = scmp.ge.s32.totalorder %s3420_s8, 4   ;;  %s4289_s26 = smov %s3341_s27 }
 0x465   : > { %s4290_s27 = smov %s3345_s28  ;;  %s4291_s28 = smov %s3430_s11 }
 0x466   : > { %s4292_s29 = smov %s3420_s8  ;;  %21 = sbr.rel (!%p19_p3) target bundleno = 6 (0x6), region = 83 }
 0x46d   :  { %2466 = vsyncpa [#allocation4], 1 }
 0x46e   :  { %2468 = vsyncpa [#allocation4 + $0x1], 1 }

</bundles_post_ra>
